<compile_context>
chip_gen: v7x
topology: tpu7x:2x2x1
jax: 0.10.0
libtpu: 0.0.40
codegen_flags: <defaults>
</compile_context>

<pallas_src>
import functools

import jax
import jax.numpy as jnp
from jax import lax
from jax.experimental import pallas as pl
from jax.experimental.pallas import tpu as pltpu  # noqa: F401  (hardware namespace)


# ----------------------------------------------------------------------------
# Parameter slab layout: one (R, 128) f32 array, weights at 8-row-aligned
# offsets, all biases packed into a single trailing 8-row block.
# ----------------------------------------------------------------------------
def _round8(r):
    return ((r + 7) // 8) * 8


def _param_layout(F, H, E):
    names_rows = [
        ("gcn_w1", F),        # (F, H)
        ("gcn_w2", H),        # (H, H)
        ("w_ih", H),          # (H, 4H)   PyTorch gate order i,f,g,o preserved
        ("w_hh", H),          # (H, 4H)
        ("w_out", H),         # (H, E)
        ("wda1", E),          # (E, H + H//2)  fused [wd1 | wa1]
        ("wd2", H),           # (H, F)
        ("wa2", H // 2),      # (H//2, 1)
        ("bias", 8),          # 8 bias rows (see pack_params)
    ]
    offs, r = {}, 0
    for name, rows in names_rows:
        offs[name] = r
        r += _round8(rows)
    return offs, r


def pack_params(p, F, H, E, slab_w=128):
    """Pack all parameters into one tile-padded (R, 128) slab (done once)."""
    offs, R = _param_layout(F, H, E)
    slab = jnp.zeros((R, slab_w), jnp.float32)

    def put(s, name, arr):
        r0 = offs[name]
        rows, cols = arr.shape
        return s.at[r0:r0 + rows, 0:cols].set(arr.astype(jnp.float32))

    slab = put(slab, "gcn_w1", p["gcn_w1"])
    slab = put(slab, "gcn_w2", p["gcn_w2"])
    slab = put(slab, "w_ih", p["w_ih_t"])
    slab = put(slab, "w_hh", p["w_hh_t"])
    slab = put(slab, "w_out", p["w_out"])
    slab = put(slab, "wda1", jnp.concatenate([p["wd1"], p["wa1"]], axis=1))
    slab = put(slab, "wd2", p["wd2"])
    slab = put(slab, "wa2", p["wa2"])

    # Bias block rows: 0 gcn_b1 | 1 gcn_b2 | 2 b_lstm | 3 b_out | 4 [bd1|ba1]
    #                  5 bd2    | 6 ba2
    b0 = offs["bias"]
    bda1 = jnp.concatenate([p["bd1"], p["ba1"]], axis=1)
    for i, b in enumerate([p["gcn_b1"], p["gcn_b2"], p["b_lstm"], p["b_out"],
                           bda1, p["bd2"], p["ba2"]]):
        slab = slab.at[b0 + i:b0 + i + 1, 0:b.shape[1]].set(b.astype(jnp.float32))
    return slab


# ----------------------------------------------------------------------------
# Single fused kernel: block-diag GCN -> unrolled LSTM -> output heads
# ----------------------------------------------------------------------------
def _fused_kernel(adj_ref, x_ref, p_ref, out_ref, *, offs, N, F, H, E, T):
    f32 = jnp.float32

    # Load the 8-row bias block once; slice rows/lanes in registers.
    b0 = offs["bias"]
    biases = p_ref[b0:b0 + 8, :]
    gcn_b1 = biases[0:1, 0:H]
    gcn_b2 = biases[1:2, 0:H]
    b_lstm = biases[2:3, 0:4 * H]            # b_ih + b_hh (PyTorch i,f,g,o order)
    b_out = biases[3:4, 0:E]
    bda1 = biases[4:5, 0:H + H // 2]         # [bd1 | ba1]
    bd2 = biases[5:6, 0:F]
    ba2 = biases[6:7, 0:1]

    # ---- Phase 1: 2-layer GCN on all T timesteps at once (block-diag adj) ----
    adj = adj_ref[...]                                                   # (TN, TN)
    w1 = p_ref[offs["gcn_w1"]:offs["gcn_w1"] + F, 0:H]
    w2 = p_ref[offs["gcn_w2"]:offs["gcn_w2"] + H, 0:H]
    h = jnp.dot(x_ref[...], w1, preferred_element_type=f32)              # (TN, H)
    h = jnp.dot(adj, h, preferred_element_type=f32) + gcn_b1
    h = jnp.maximum(h, 0.0)                   # ReLU (dropout = identity in eval)
    h = jnp.dot(h, w2, preferred_element_type=f32)
    h = jnp.dot(adj, h, preferred_element_type=f32) + gcn_b2
    spatial = jnp.maximum(h, 0.0)                                        # (TN, H)

    # ---- Phase 2: LSTM over T; input-gate matmul hoisted out of recurrence ----
    w_ih = p_ref[offs["w_ih"]:offs["w_ih"] + H, 0:4 * H]
    w_hh = p_ref[offs["w_hh"]:offs["w_hh"] + H, 0:4 * H]
    # One (TN, H) @ (H, 4H) matmul instead of T under-filled ones in the chain.
    gates_in = jnp.dot(spatial, w_ih, preferred_element_type=f32) + b_lstm  # (TN, 4H)

    h_t = jnp.zeros((N, H), f32)
    c_t = jnp.zeros((N, H), f32)
    for t in range(T):                       # T small & static: full unroll
        gates = (gates_in[t * N:(t + 1) * N, :]
                 + jnp.dot(h_t, w_hh, preferred_element_type=f32))       # (N, 4H)
        i_g = jax.nn.sigmoid(gates[:, 0:H])
        f_g = jax.nn.sigmoid(gates[:, H:2 * H])
        g_g = jnp.tanh(gates[:, 2 * H:3 * H])
        o_g = jax.nn.sigmoid(gates[:, 3 * H:4 * H])
        c_t = f_g * c_t + i_g * g_g
        h_t = o_g * jnp.tanh(c_t)
    # h_t == lstm_out[:, -1, :]

    # ---- Phase 3: output heads ----
    w_out = p_ref[offs["w_out"]:offs["w_out"] + H, 0:E]
    emb = jnp.dot(h_t, w_out, preferred_element_type=f32) + b_out        # (N, E)

    # Fused first layer of node_decoder + anomaly_predictor (shared LHS emb).
    wda1 = p_ref[offs["wda1"]:offs["wda1"] + E, 0:H + H // 2]
    da = jnp.maximum(jnp.dot(emb, wda1, preferred_element_type=f32) + bda1, 0.0)

    wd2 = p_ref[offs["wd2"]:offs["wd2"] + H, 0:F]
    recon = jnp.dot(da[:, 0:H], wd2, preferred_element_type=f32) + bd2   # (N, F)

    wa2 = p_ref[offs["wa2"]:offs["wa2"] + H // 2, 0:1]
    score = jax.nn.sigmoid(
        jnp.dot(da[:, H:H + H // 2], wa2, preferred_element_type=f32) + ba2)  # (N, 1)

    # emb @ emb.T by contracting the last dims of both operands.
    edge = jax.nn.sigmoid(
        lax.dot_general(emb, emb, dimension_numbers=(((1,), (1,)), ((), ())),
                        preferred_element_type=f32))                     # (N, N)

    # One full-width lane-dense store: [emb | recon | edge | score | 0 pad].
    pad = jnp.zeros((N, out_ref.shape[1] - (E + F + N + 1)), f32)
    out_ref[...] = jnp.concatenate([emb, recon, edge, score, pad], axis=1)


def make_forward(N, F, H, E, T, slab_w=128):
    """Build the fused forward fn for fixed static sizes."""
    assert E + F + N + 1 <= slab_w, "output slab overflow; widen slab_w"
    offs, _ = _param_layout(F, H, E)
    kernel = functools.partial(_fused_kernel, offs=offs, N=N, F=F, H=H, E=E, T=T)

    def forward(x_seq, adj_seq, p_slab):
        # Block-diagonal normalized adjacency (T*N, T*N): one GCN matmul pass.
        eye_t = jnp.eye(T, dtype=adj_seq.dtype)
        adj_bd = (eye_t[:, None, :, None] * adj_seq[:, :, None, :]).reshape(T * N, T * N)
        x_flat = x_seq.reshape(T * N, F)

        slab = pl.pallas_call(
            kernel,
            out_shape=jax.ShapeDtypeStruct((N, slab_w), jnp.float32),
        )(adj_bd, x_flat, p_slab)

        embeddings = slab[:, 0:E]
        node_recon = slab[:, E:E + F]
        edge_recon = slab[:, E + F:E + F + N]
        anomaly_scores = slab[:, E + F + N:E + F + N + 1]
        return embeddings, node_recon, edge_recon, anomaly_scores

    return forward


# ----------------------------------------------------------------------------
# Glue: dense normalized adjacency from edge_index (PyG gcn_norm semantics)
# Note: duplicate edges are collapsed (simple-graph assumption).
# ----------------------------------------------------------------------------
def normalized_adjacency(edge_index, num_nodes):
    src, dst = edge_index[0], edge_index[1]
    a = jnp.zeros((num_nodes, num_nodes), jnp.float32).at[dst, src].set(1.0)
    a = a.at[jnp.arange(num_nodes), jnp.arange(num_nodes)].set(1.0)   # self loops
    deg = a.sum(axis=1)
    dinv = jax.lax.rsqrt(deg)
    return a * dinv[:, None] * dinv[None, :]


# ----------------------------------------------------------------------------
# Main
# ----------------------------------------------------------------------------
if __name__ == "__main__":
    N, F, H, E, T = 16, 8, 32, 16, 8   # nodes, node_features, hidden, embedding, seq_len

    key = jax.random.PRNGKey(0)
    ks = jax.random.split(key, 16)

    # Deterministic parameters (weights stored pre-transposed: [in, out]).
    s = 0.1
    params = {
        "gcn_w1": s * jax.random.normal(ks[0], (F, H), jnp.float32),
        "gcn_b1": s * jax.random.normal(ks[1], (1, H), jnp.float32),
        "gcn_w2": s * jax.random.normal(ks[2], (H, H), jnp.float32),
        "gcn_b2": s * jax.random.normal(ks[3], (1, H), jnp.float32),
        "w_ih_t": s * jax.random.normal(ks[4], (H, 4 * H), jnp.float32),
        "w_hh_t": s * jax.random.normal(ks[5], (H, 4 * H), jnp.float32),
        "b_lstm": s * jax.random.normal(ks[6], (1, 4 * H), jnp.float32),  # b_ih + b_hh
        "w_out":  s * jax.random.normal(ks[7], (H, E), jnp.float32),
        "b_out":  s * jax.random.normal(ks[8], (1, E), jnp.float32),
        "wd1":    s * jax.random.normal(ks[9], (E, H), jnp.float32),
        "bd1":    s * jax.random.normal(ks[10], (1, H), jnp.float32),
        "wd2":    s * jax.random.normal(ks[11], (H, F), jnp.float32),
        "bd2":    s * jax.random.normal(ks[12], (1, F), jnp.float32),
        "wa1":    s * jax.random.normal(ks[13], (E, H // 2), jnp.float32),
        "ba1":    s * jax.random.normal(ks[14], (1, H // 2), jnp.float32),
        "wa2":    s * jax.random.normal(ks[15], (H // 2, 1), jnp.float32),
        "ba2":    jnp.zeros((1, 1), jnp.float32),
    }
    # Pack all parameters into one tile-aligned HBM slab (single startup DMA).
    p_slab = pack_params(params, F, H, E)

    # Deterministic inputs: node-feature sequence + per-timestep edge_index.
    x_seq = jax.random.normal(jax.random.PRNGKey(42), (T, N, F), jnp.float32)

    adjs = []
    for t in range(T):
        src = jnp.arange(N, dtype=jnp.int32)
        dst = (src + 1 + t) % N
        edge_index_t = jnp.stack(
            [jnp.concatenate([src, dst]), jnp.concatenate([dst, src])], axis=0)  # [2, 2N]
        adjs.append(normalized_adjacency(edge_index_t, N))
    adj_seq = jnp.stack(adjs, axis=0)    # [T, N, N]

    forward = jax.jit(make_forward(N, F, H, E, T))
    embeddings, node_recon, edge_recon, anomaly_scores = forward(x_seq, adj_seq, p_slab)
    jax.block_until_ready((embeddings, node_recon, edge_recon, anomaly_scores))

    assert embeddings.shape == (N, E)
    assert node_recon.shape == (N, F)
    assert edge_recon.shape == (N, N)
    assert anomaly_scores.shape == (N, 1)
    assert bool(jnp.all(jnp.isfinite(embeddings)))
    assert bool(jnp.all(jnp.isfinite(node_recon)))
    assert bool(jnp.all((edge_recon >= 0.0) & (edge_recon <= 1.0)))
    assert bool(jnp.all((anomaly_scores >= 0.0) & (anomaly_scores <= 1.0)))
    print("KERNEL_OK")
</pallas_src>

<mosaic_0001>
module attributes {stable_mosaic.version = 11 : i64} {
  func.func @_fused_kernel(%arg0: memref<128x128xf32, #tpu.memory_space<vmem>>, %arg1: memref<128x8xf32, #tpu.memory_space<vmem>>, %arg2: memref<208x128xf32, #tpu.memory_space<vmem>>, %arg3: memref<16x128xf32, #tpu.memory_space<vmem>>) attributes {dimension_semantics = [], scalar_prefetch = 0 : i64, scratch_operands = 0 : i64, tpu.core_type = #tpu.core_type<tc>} {
    %c200 = arith.constant 200 : index
    %c0 = arith.constant 0 : index
    %0 = vector.load %arg2[%c200, %c0] : memref<208x128xf32, #tpu.memory_space<vmem>>, vector<8x128xf32>
    %1 = vector.extract_strided_slice %0 {offsets = [0, 0], sizes = [1, 32], strides = [1, 1]} : vector<8x128xf32> to vector<1x32xf32>
    %2 = vector.extract_strided_slice %0 {offsets = [1, 0], sizes = [1, 32], strides = [1, 1]} : vector<8x128xf32> to vector<1x32xf32>
    %3 = vector.extract_strided_slice %0 {offsets = [2, 0], sizes = [1, 128], strides = [1, 1]} : vector<8x128xf32> to vector<1x128xf32>
    %4 = vector.extract_strided_slice %0 {offsets = [3, 0], sizes = [1, 16], strides = [1, 1]} : vector<8x128xf32> to vector<1x16xf32>
    %5 = vector.extract_strided_slice %0 {offsets = [4, 0], sizes = [1, 48], strides = [1, 1]} : vector<8x128xf32> to vector<1x48xf32>
    %6 = vector.extract_strided_slice %0 {offsets = [5, 0], sizes = [1, 8], strides = [1, 1]} : vector<8x128xf32> to vector<1x8xf32>
    %7 = vector.extract_strided_slice %0 {offsets = [6, 0], sizes = [1, 1], strides = [1, 1]} : vector<8x128xf32> to vector<1x1xf32>
    %c0_0 = arith.constant 0 : index
    %c0_1 = arith.constant 0 : index
    %8 = vector.load %arg0[%c0_0, %c0_1] : memref<128x128xf32, #tpu.memory_space<vmem>>, vector<128x128xf32>
    %c0_2 = arith.constant 0 : index
    %c0_3 = arith.constant 0 : index
    %9 = vector.load %arg2[%c0_2, %c0_3] : memref<208x128xf32, #tpu.memory_space<vmem>>, vector<8x32xf32>
    %c8 = arith.constant 8 : index
    %c0_4 = arith.constant 0 : index
    %10 = vector.load %arg2[%c8, %c0_4] : memref<208x128xf32, #tpu.memory_space<vmem>>, vector<32x32xf32>
    %c0_5 = arith.constant 0 : index
    %c0_6 = arith.constant 0 : index
    %11 = vector.load %arg1[%c0_5, %c0_6] : memref<128x8xf32, #tpu.memory_space<vmem>>, vector<128x8xf32>
    %cst = arith.constant dense<0.000000e+00> : vector<128x32xf32>
    %12 = tpu.matmul %11, %9, %cst {dimension_numbers = #tpu.dot_dimension_numbers<[1], [0], [0], [1], [0, 0, 1, 1], [], []>} : vector<128x8xf32>, vector<8x32xf32>, vector<128x32xf32> -> vector<128x32xf32>
    %cst_7 = arith.constant dense<0.000000e+00> : vector<128x32xf32>
    %13 = tpu.matmul %8, %12, %cst_7 {dimension_numbers = #tpu.dot_dimension_numbers<[1], [0], [0], [1], [0, 0, 1, 1], [], []>} : vector<128x128xf32>, vector<128x32xf32>, vector<128x32xf32> -> vector<128x32xf32>
    %14 = vector.broadcast %1 : vector<1x32xf32> to vector<128x32xf32>
    %15 = arith.addf %13, %14 : vector<128x32xf32>
    %cst_8 = arith.constant 0.000000e+00 : f32
    %16 = vector.broadcast %cst_8 : f32 to vector<128x32xf32>
    %17 = arith.maximumf %15, %16 : vector<128x32xf32>
    %cst_9 = arith.constant dense<0.000000e+00> : vector<128x32xf32>
    %18 = tpu.matmul %17, %10, %cst_9 {dimension_numbers = #tpu.dot_dimension_numbers<[1], [0], [0], [1], [0, 0, 1, 1], [], []>} : vector<128x32xf32>, vector<32x32xf32>, vector<128x32xf32> -> vector<128x32xf32>
    %cst_10 = arith.constant dense<0.000000e+00> : vector<128x32xf32>
    %19 = tpu.matmul %8, %18, %cst_10 {dimension_numbers = #tpu.dot_dimension_numbers<[1], [0], [0], [1], [0, 0, 1, 1], [], []>} : vector<128x128xf32>, vector<128x32xf32>, vector<128x32xf32> -> vector<128x32xf32>
    %20 = vector.broadcast %2 : vector<1x32xf32> to vector<128x32xf32>
    %21 = arith.addf %19, %20 : vector<128x32xf32>
    %cst_11 = arith.constant 0.000000e+00 : f32
    %22 = vector.broadcast %cst_11 : f32 to vector<128x32xf32>
    %23 = arith.maximumf %21, %22 : vector<128x32xf32>
    %c40 = arith.constant 40 : index
    %c0_12 = arith.constant 0 : index
    %24 = vector.load %arg2[%c40, %c0_12] : memref<208x128xf32, #tpu.memory_space<vmem>>, vector<32x128xf32>
    %c72 = arith.constant 72 : index
    %c0_13 = arith.constant 0 : index
    %25 = vector.load %arg2[%c72, %c0_13] : memref<208x128xf32, #tpu.memory_space<vmem>>, vector<32x128xf32>
    %cst_14 = arith.constant dense<0.000000e+00> : vector<128x128xf32>
    %26 = tpu.matmul %23, %24, %cst_14 {dimension_numbers = #tpu.dot_dimension_numbers<[1], [0], [0], [1], [0, 0, 1, 1], [], []>} : vector<128x32xf32>, vector<32x128xf32>, vector<128x128xf32> -> vector<128x128xf32>
    %27 = vector.broadcast %3 : vector<1x128xf32> to vector<128x128xf32>
    %28 = arith.addf %26, %27 : vector<128x128xf32>
    %cst_15 = arith.constant 0.000000e+00 : f32
    %29 = vector.broadcast %cst_15 : f32 to vector<16x32xf32>
    %cst_16 = arith.constant 0.000000e+00 : f32
    %30 = vector.broadcast %cst_16 : f32 to vector<16x32xf32>
    %31 = vector.extract_strided_slice %28 {offsets = [0, 0], sizes = [16, 128], strides = [1, 1]} : vector<128x128xf32> to vector<16x128xf32>
    %cst_17 = arith.constant dense<0.000000e+00> : vector<16x128xf32>
    %32 = tpu.matmul %29, %25, %cst_17 {dimension_numbers = #tpu.dot_dimension_numbers<[1], [0], [0], [1], [0, 0, 1, 1], [], []>} : vector<16x32xf32>, vector<32x128xf32>, vector<16x128xf32> -> vector<16x128xf32>
    %33 = arith.addf %31, %32 : vector<16x128xf32>
    %34 = vector.extract_strided_slice %33 {offsets = [0, 0], sizes = [16, 32], strides = [1, 1]} : vector<16x128xf32> to vector<16x32xf32>
    %35 = arith.negf %34 : vector<16x32xf32>
    %36 = math.exp %35 : vector<16x32xf32>
    %cst_18 = arith.constant 1.000000e+00 : f32
    %37 = vector.broadcast %cst_18 : f32 to vector<16x32xf32>
    %38 = arith.addf %37, %36 : vector<16x32xf32>
    %39 = arith.divf %37, %38 : vector<16x32xf32>
    %40 = vector.extract_strided_slice %33 {offsets = [0, 32], sizes = [16, 32], strides = [1, 1]} : vector<16x128xf32> to vector<16x32xf32>
    %41 = arith.negf %40 : vector<16x32xf32>
    %42 = math.exp %41 : vector<16x32xf32>
    %cst_19 = arith.constant 1.000000e+00 : f32
    %43 = vector.broadcast %cst_19 : f32 to vector<16x32xf32>
    %44 = arith.addf %43, %42 : vector<16x32xf32>
    %45 = arith.divf %43, %44 : vector<16x32xf32>
    %46 = vector.extract_strided_slice %33 {offsets = [0, 64], sizes = [16, 32], strides = [1, 1]} : vector<16x128xf32> to vector<16x32xf32>
    %47 = math.tanh %46 : vector<16x32xf32>
    %48 = vector.extract_strided_slice %33 {offsets = [0, 96], sizes = [16, 32], strides = [1, 1]} : vector<16x128xf32> to vector<16x32xf32>
    %49 = arith.negf %48 : vector<16x32xf32>
    %50 = math.exp %49 : vector<16x32xf32>
    %cst_20 = arith.constant 1.000000e+00 : f32
    %51 = vector.broadcast %cst_20 : f32 to vector<16x32xf32>
    %52 = arith.addf %51, %50 : vector<16x32xf32>
    %53 = arith.divf %51, %52 : vector<16x32xf32>
    %54 = arith.mulf %45, %30 : vector<16x32xf32>
    %55 = arith.mulf %39, %47 : vector<16x32xf32>
    %56 = arith.addf %54, %55 : vector<16x32xf32>
    %57 = math.tanh %56 : vector<16x32xf32>
    %58 = arith.mulf %53, %57 : vector<16x32xf32>
    %59 = vector.extract_strided_slice %28 {offsets = [16, 0], sizes = [16, 128], strides = [1, 1]} : vector<128x128xf32> to vector<16x128xf32>
    %cst_21 = arith.constant dense<0.000000e+00> : vector<16x128xf32>
    %60 = tpu.matmul %58, %25, %cst_21 {dimension_numbers = #tpu.dot_dimension_numbers<[1], [0], [0], [1], [0, 0, 1, 1], [], []>} : vector<16x32xf32>, vector<32x128xf32>, vector<16x128xf32> -> vector<16x128xf32>
    %61 = arith.addf %59, %60 : vector<16x128xf32>
    %62 = vector.extract_strided_slice %61 {offsets = [0, 0], sizes = [16, 32], strides = [1, 1]} : vector<16x128xf32> to vector<16x32xf32>
    %63 = arith.negf %62 : vector<16x32xf32>
    %64 = math.exp %63 : vector<16x32xf32>
    %cst_22 = arith.constant 1.000000e+00 : f32
    %65 = vector.broadcast %cst_22 : f32 to vector<16x32xf32>
    %66 = arith.addf %65, %64 : vector<16x32xf32>
    %67 = arith.divf %65, %66 : vector<16x32xf32>
    %68 = vector.extract_strided_slice %61 {offsets = [0, 32], sizes = [16, 32], strides = [1, 1]} : vector<16x128xf32> to vector<16x32xf32>
    %69 = arith.negf %68 : vector<16x32xf32>
    %70 = math.exp %69 : vector<16x32xf32>
    %cst_23 = arith.constant 1.000000e+00 : f32
    %71 = vector.broadcast %cst_23 : f32 to vector<16x32xf32>
    %72 = arith.addf %71, %70 : vector<16x32xf32>
    %73 = arith.divf %71, %72 : vector<16x32xf32>
    %74 = vector.extract_strided_slice %61 {offsets = [0, 64], sizes = [16, 32], strides = [1, 1]} : vector<16x128xf32> to vector<16x32xf32>
    %75 = math.tanh %74 : vector<16x32xf32>
    %76 = vector.extract_strided_slice %61 {offsets = [0, 96], sizes = [16, 32], strides = [1, 1]} : vector<16x128xf32> to vector<16x32xf32>
    %77 = arith.negf %76 : vector<16x32xf32>
    %78 = math.exp %77 : vector<16x32xf32>
    %cst_24 = arith.constant 1.000000e+00 : f32
    %79 = vector.broadcast %cst_24 : f32 to vector<16x32xf32>
    %80 = arith.addf %79, %78 : vector<16x32xf32>
    %81 = arith.divf %79, %80 : vector<16x32xf32>
    %82 = arith.mulf %73, %56 : vector<16x32xf32>
    %83 = arith.mulf %67, %75 : vector<16x32xf32>
    %84 = arith.addf %82, %83 : vector<16x32xf32>
    %85 = math.tanh %84 : vector<16x32xf32>
    %86 = arith.mulf %81, %85 : vector<16x32xf32>
    %87 = vector.extract_strided_slice %28 {offsets = [32, 0], sizes = [16, 128], strides = [1, 1]} : vector<128x128xf32> to vector<16x128xf32>
    %cst_25 = arith.constant dense<0.000000e+00> : vector<16x128xf32>
    %88 = tpu.matmul %86, %25, %cst_25 {dimension_numbers = #tpu.dot_dimension_numbers<[1], [0], [0], [1], [0, 0, 1, 1], [], []>} : vector<16x32xf32>, vector<32x128xf32>, vector<16x128xf32> -> vector<16x128xf32>
    %89 = arith.addf %87, %88 : vector<16x128xf32>
    %90 = vector.extract_strided_slice %89 {offsets = [0, 0], sizes = [16, 32], strides = [1, 1]} : vector<16x128xf32> to vector<16x32xf32>
    %91 = arith.negf %90 : vector<16x32xf32>
    %92 = math.exp %91 : vector<16x32xf32>
    %cst_26 = arith.constant 1.000000e+00 : f32
    %93 = vector.broadcast %cst_26 : f32 to vector<16x32xf32>
    %94 = arith.addf %93, %92 : vector<16x32xf32>
    %95 = arith.divf %93, %94 : vector<16x32xf32>
    %96 = vector.extract_strided_slice %89 {offsets = [0, 32], sizes = [16, 32], strides = [1, 1]} : vector<16x128xf32> to vector<16x32xf32>
    %97 = arith.negf %96 : vector<16x32xf32>
    %98 = math.exp %97 : vector<16x32xf32>
    %cst_27 = arith.constant 1.000000e+00 : f32
    %99 = vector.broadcast %cst_27 : f32 to vector<16x32xf32>
    %100 = arith.addf %99, %98 : vector<16x32xf32>
    %101 = arith.divf %99, %100 : vector<16x32xf32>
    %102 = vector.extract_strided_slice %89 {offsets = [0, 64], sizes = [16, 32], strides = [1, 1]} : vector<16x128xf32> to vector<16x32xf32>
    %103 = math.tanh %102 : vector<16x32xf32>
    %104 = vector.extract_strided_slice %89 {offsets = [0, 96], sizes = [16, 32], strides = [1, 1]} : vector<16x128xf32> to vector<16x32xf32>
    %105 = arith.negf %104 : vector<16x32xf32>
    %106 = math.exp %105 : vector<16x32xf32>
    %cst_28 = arith.constant 1.000000e+00 : f32
    %107 = vector.broadcast %cst_28 : f32 to vector<16x32xf32>
    %108 = arith.addf %107, %106 : vector<16x32xf32>
    %109 = arith.divf %107, %108 : vector<16x32xf32>
    %110 = arith.mulf %101, %84 : vector<16x32xf32>
    %111 = arith.mulf %95, %103 : vector<16x32xf32>
    %112 = arith.addf %110, %111 : vector<16x32xf32>
    %113 = math.tanh %112 : vector<16x32xf32>
    %114 = arith.mulf %109, %113 : vector<16x32xf32>
    %115 = vector.extract_strided_slice %28 {offsets = [48, 0], sizes = [16, 128], strides = [1, 1]} : vector<128x128xf32> to vector<16x128xf32>
    %cst_29 = arith.constant dense<0.000000e+00> : vector<16x128xf32>
    %116 = tpu.matmul %114, %25, %cst_29 {dimension_numbers = #tpu.dot_dimension_numbers<[1], [0], [0], [1], [0, 0, 1, 1], [], []>} : vector<16x32xf32>, vector<32x128xf32>, vector<16x128xf32> -> vector<16x128xf32>
    %117 = arith.addf %115, %116 : vector<16x128xf32>
    %118 = vector.extract_strided_slice %117 {offsets = [0, 0], sizes = [16, 32], strides = [1, 1]} : vector<16x128xf32> to vector<16x32xf32>
    %119 = arith.negf %118 : vector<16x32xf32>
    %120 = math.exp %119 : vector<16x32xf32>
    %cst_30 = arith.constant 1.000000e+00 : f32
    %121 = vector.broadcast %cst_30 : f32 to vector<16x32xf32>
    %122 = arith.addf %121, %120 : vector<16x32xf32>
    %123 = arith.divf %121, %122 : vector<16x32xf32>
    %124 = vector.extract_strided_slice %117 {offsets = [0, 32], sizes = [16, 32], strides = [1, 1]} : vector<16x128xf32> to vector<16x32xf32>
    %125 = arith.negf %124 : vector<16x32xf32>
    %126 = math.exp %125 : vector<16x32xf32>
    %cst_31 = arith.constant 1.000000e+00 : f32
    %127 = vector.broadcast %cst_31 : f32 to vector<16x32xf32>
    %128 = arith.addf %127, %126 : vector<16x32xf32>
    %129 = arith.divf %127, %128 : vector<16x32xf32>
    %130 = vector.extract_strided_slice %117 {offsets = [0, 64], sizes = [16, 32], strides = [1, 1]} : vector<16x128xf32> to vector<16x32xf32>
    %131 = math.tanh %130 : vector<16x32xf32>
    %132 = vector.extract_strided_slice %117 {offsets = [0, 96], sizes = [16, 32], strides = [1, 1]} : vector<16x128xf32> to vector<16x32xf32>
    %133 = arith.negf %132 : vector<16x32xf32>
    %134 = math.exp %133 : vector<16x32xf32>
    %cst_32 = arith.constant 1.000000e+00 : f32
    %135 = vector.broadcast %cst_32 : f32 to vector<16x32xf32>
    %136 = arith.addf %135, %134 : vector<16x32xf32>
    %137 = arith.divf %135, %136 : vector<16x32xf32>
    %138 = arith.mulf %129, %112 : vector<16x32xf32>
    %139 = arith.mulf %123, %131 : vector<16x32xf32>
    %140 = arith.addf %138, %139 : vector<16x32xf32>
    %141 = math.tanh %140 : vector<16x32xf32>
    %142 = arith.mulf %137, %141 : vector<16x32xf32>
    %143 = vector.extract_strided_slice %28 {offsets = [64, 0], sizes = [16, 128], strides = [1, 1]} : vector<128x128xf32> to vector<16x128xf32>
    %cst_33 = arith.constant dense<0.000000e+00> : vector<16x128xf32>
    %144 = tpu.matmul %142, %25, %cst_33 {dimension_numbers = #tpu.dot_dimension_numbers<[1], [0], [0], [1], [0, 0, 1, 1], [], []>} : vector<16x32xf32>, vector<32x128xf32>, vector<16x128xf32> -> vector<16x128xf32>
    %145 = arith.addf %143, %144 : vector<16x128xf32>
    %146 = vector.extract_strided_slice %145 {offsets = [0, 0], sizes = [16, 32], strides = [1, 1]} : vector<16x128xf32> to vector<16x32xf32>
    %147 = arith.negf %146 : vector<16x32xf32>
    %148 = math.exp %147 : vector<16x32xf32>
    %cst_34 = arith.constant 1.000000e+00 : f32
    %149 = vector.broadcast %cst_34 : f32 to vector<16x32xf32>
    %150 = arith.addf %149, %148 : vector<16x32xf32>
    %151 = arith.divf %149, %150 : vector<16x32xf32>
    %152 = vector.extract_strided_slice %145 {offsets = [0, 32], sizes = [16, 32], strides = [1, 1]} : vector<16x128xf32> to vector<16x32xf32>
    %153 = arith.negf %152 : vector<16x32xf32>
    %154 = math.exp %153 : vector<16x32xf32>
    %cst_35 = arith.constant 1.000000e+00 : f32
    %155 = vector.broadcast %cst_35 : f32 to vector<16x32xf32>
    %156 = arith.addf %155, %154 : vector<16x32xf32>
    %157 = arith.divf %155, %156 : vector<16x32xf32>
    %158 = vector.extract_strided_slice %145 {offsets = [0, 64], sizes = [16, 32], strides = [1, 1]} : vector<16x128xf32> to vector<16x32xf32>
    %159 = math.tanh %158 : vector<16x32xf32>
    %160 = vector.extract_strided_slice %145 {offsets = [0, 96], sizes = [16, 32], strides = [1, 1]} : vector<16x128xf32> to vector<16x32xf32>
    %161 = arith.negf %160 : vector<16x32xf32>
    %162 = math.exp %161 : vector<16x32xf32>
    %cst_36 = arith.constant 1.000000e+00 : f32
    %163 = vector.broadcast %cst_36 : f32 to vector<16x32xf32>
    %164 = arith.addf %163, %162 : vector<16x32xf32>
    %165 = arith.divf %163, %164 : vector<16x32xf32>
    %166 = arith.mulf %157, %140 : vector<16x32xf32>
    %167 = arith.mulf %151, %159 : vector<16x32xf32>
    %168 = arith.addf %166, %167 : vector<16x32xf32>
    %169 = math.tanh %168 : vector<16x32xf32>
    %170 = arith.mulf %165, %169 : vector<16x32xf32>
    %171 = vector.extract_strided_slice %28 {offsets = [80, 0], sizes = [16, 128], strides = [1, 1]} : vector<128x128xf32> to vector<16x128xf32>
    %cst_37 = arith.constant dense<0.000000e+00> : vector<16x128xf32>
    %172 = tpu.matmul %170, %25, %cst_37 {dimension_numbers = #tpu.dot_dimension_numbers<[1], [0], [0], [1], [0, 0, 1, 1], [], []>} : vector<16x32xf32>, vector<32x128xf32>, vector<16x128xf32> -> vector<16x128xf32>
    %173 = arith.addf %171, %172 : vector<16x128xf32>
    %174 = vector.extract_strided_slice %173 {offsets = [0, 0], sizes = [16, 32], strides = [1, 1]} : vector<16x128xf32> to vector<16x32xf32>
    %175 = arith.negf %174 : vector<16x32xf32>
    %176 = math.exp %175 : vector<16x32xf32>
    %cst_38 = arith.constant 1.000000e+00 : f32
    %177 = vector.broadcast %cst_38 : f32 to vector<16x32xf32>
    %178 = arith.addf %177, %176 : vector<16x32xf32>
    %179 = arith.divf %177, %178 : vector<16x32xf32>
    %180 = vector.extract_strided_slice %173 {offsets = [0, 32], sizes = [16, 32], strides = [1, 1]} : vector<16x128xf32> to vector<16x32xf32>
    %181 = arith.negf %180 : vector<16x32xf32>
    %182 = math.exp %181 : vector<16x32xf32>
    %cst_39 = arith.constant 1.000000e+00 : f32
    %183 = vector.broadcast %cst_39 : f32 to vector<16x32xf32>
    %184 = arith.addf %183, %182 : vector<16x32xf32>
    %185 = arith.divf %183, %184 : vector<16x32xf32>
    %186 = vector.extract_strided_slice %173 {offsets = [0, 64], sizes = [16, 32], strides = [1, 1]} : vector<16x128xf32> to vector<16x32xf32>
    %187 = math.tanh %186 : vector<16x32xf32>
    %188 = vector.extract_strided_slice %173 {offsets = [0, 96], sizes = [16, 32], strides = [1, 1]} : vector<16x128xf32> to vector<16x32xf32>
    %189 = arith.negf %188 : vector<16x32xf32>
    %190 = math.exp %189 : vector<16x32xf32>
    %cst_40 = arith.constant 1.000000e+00 : f32
    %191 = vector.broadcast %cst_40 : f32 to vector<16x32xf32>
    %192 = arith.addf %191, %190 : vector<16x32xf32>
    %193 = arith.divf %191, %192 : vector<16x32xf32>
    %194 = arith.mulf %185, %168 : vector<16x32xf32>
    %195 = arith.mulf %179, %187 : vector<16x32xf32>
    %196 = arith.addf %194, %195 : vector<16x32xf32>
    %197 = math.tanh %196 : vector<16x32xf32>
    %198 = arith.mulf %193, %197 : vector<16x32xf32>
    %199 = vector.extract_strided_slice %28 {offsets = [96, 0], sizes = [16, 128], strides = [1, 1]} : vector<128x128xf32> to vector<16x128xf32>
    %cst_41 = arith.constant dense<0.000000e+00> : vector<16x128xf32>
    %200 = tpu.matmul %198, %25, %cst_41 {dimension_numbers = #tpu.dot_dimension_numbers<[1], [0], [0], [1], [0, 0, 1, 1], [], []>} : vector<16x32xf32>, vector<32x128xf32>, vector<16x128xf32> -> vector<16x128xf32>
    %201 = arith.addf %199, %200 : vector<16x128xf32>
    %202 = vector.extract_strided_slice %201 {offsets = [0, 0], sizes = [16, 32], strides = [1, 1]} : vector<16x128xf32> to vector<16x32xf32>
    %203 = arith.negf %202 : vector<16x32xf32>
    %204 = math.exp %203 : vector<16x32xf32>
    %cst_42 = arith.constant 1.000000e+00 : f32
    %205 = vector.broadcast %cst_42 : f32 to vector<16x32xf32>
    %206 = arith.addf %205, %204 : vector<16x32xf32>
    %207 = arith.divf %205, %206 : vector<16x32xf32>
    %208 = vector.extract_strided_slice %201 {offsets = [0, 32], sizes = [16, 32], strides = [1, 1]} : vector<16x128xf32> to vector<16x32xf32>
    %209 = arith.negf %208 : vector<16x32xf32>
    %210 = math.exp %209 : vector<16x32xf32>
    %cst_43 = arith.constant 1.000000e+00 : f32
    %211 = vector.broadcast %cst_43 : f32 to vector<16x32xf32>
    %212 = arith.addf %211, %210 : vector<16x32xf32>
    %213 = arith.divf %211, %212 : vector<16x32xf32>
    %214 = vector.extract_strided_slice %201 {offsets = [0, 64], sizes = [16, 32], strides = [1, 1]} : vector<16x128xf32> to vector<16x32xf32>
    %215 = math.tanh %214 : vector<16x32xf32>
    %216 = vector.extract_strided_slice %201 {offsets = [0, 96], sizes = [16, 32], strides = [1, 1]} : vector<16x128xf32> to vector<16x32xf32>
    %217 = arith.negf %216 : vector<16x32xf32>
    %218 = math.exp %217 : vector<16x32xf32>
    %cst_44 = arith.constant 1.000000e+00 : f32
    %219 = vector.broadcast %cst_44 : f32 to vector<16x32xf32>
    %220 = arith.addf %219, %218 : vector<16x32xf32>
    %221 = arith.divf %219, %220 : vector<16x32xf32>
    %222 = arith.mulf %213, %196 : vector<16x32xf32>
    %223 = arith.mulf %207, %215 : vector<16x32xf32>
    %224 = arith.addf %222, %223 : vector<16x32xf32>
    %225 = math.tanh %224 : vector<16x32xf32>
    %226 = arith.mulf %221, %225 : vector<16x32xf32>
    %227 = vector.extract_strided_slice %28 {offsets = [112, 0], sizes = [16, 128], strides = [1, 1]} : vector<128x128xf32> to vector<16x128xf32>
    %cst_45 = arith.constant dense<0.000000e+00> : vector<16x128xf32>
    %228 = tpu.matmul %226, %25, %cst_45 {dimension_numbers = #tpu.dot_dimension_numbers<[1], [0], [0], [1], [0, 0, 1, 1], [], []>} : vector<16x32xf32>, vector<32x128xf32>, vector<16x128xf32> -> vector<16x128xf32>
    %229 = arith.addf %227, %228 : vector<16x128xf32>
    %230 = vector.extract_strided_slice %229 {offsets = [0, 0], sizes = [16, 32], strides = [1, 1]} : vector<16x128xf32> to vector<16x32xf32>
    %231 = arith.negf %230 : vector<16x32xf32>
    %232 = math.exp %231 : vector<16x32xf32>
    %cst_46 = arith.constant 1.000000e+00 : f32
    %233 = vector.broadcast %cst_46 : f32 to vector<16x32xf32>
    %234 = arith.addf %233, %232 : vector<16x32xf32>
    %235 = arith.divf %233, %234 : vector<16x32xf32>
    %236 = vector.extract_strided_slice %229 {offsets = [0, 32], sizes = [16, 32], strides = [1, 1]} : vector<16x128xf32> to vector<16x32xf32>
    %237 = arith.negf %236 : vector<16x32xf32>
    %238 = math.exp %237 : vector<16x32xf32>
    %cst_47 = arith.constant 1.000000e+00 : f32
    %239 = vector.broadcast %cst_47 : f32 to vector<16x32xf32>
    %240 = arith.addf %239, %238 : vector<16x32xf32>
    %241 = arith.divf %239, %240 : vector<16x32xf32>
    %242 = vector.extract_strided_slice %229 {offsets = [0, 64], sizes = [16, 32], strides = [1, 1]} : vector<16x128xf32> to vector<16x32xf32>
    %243 = math.tanh %242 : vector<16x32xf32>
    %244 = vector.extract_strided_slice %229 {offsets = [0, 96], sizes = [16, 32], strides = [1, 1]} : vector<16x128xf32> to vector<16x32xf32>
    %245 = arith.negf %244 : vector<16x32xf32>
    %246 = math.exp %245 : vector<16x32xf32>
    %cst_48 = arith.constant 1.000000e+00 : f32
    %247 = vector.broadcast %cst_48 : f32 to vector<16x32xf32>
    %248 = arith.addf %247, %246 : vector<16x32xf32>
    %249 = arith.divf %247, %248 : vector<16x32xf32>
    %250 = arith.mulf %241, %224 : vector<16x32xf32>
    %251 = arith.mulf %235, %243 : vector<16x32xf32>
    %252 = arith.addf %250, %251 : vector<16x32xf32>
    %253 = math.tanh %252 : vector<16x32xf32>
    %254 = arith.mulf %249, %253 : vector<16x32xf32>
    %c104 = arith.constant 104 : index
    %c0_49 = arith.constant 0 : index
    %255 = vector.load %arg2[%c104, %c0_49] : memref<208x128xf32, #tpu.memory_space<vmem>>, vector<32x16xf32>
    %cst_50 = arith.constant dense<0.000000e+00> : vector<16x16xf32>
    %256 = tpu.matmul %254, %255, %cst_50 {dimension_numbers = #tpu.dot_dimension_numbers<[1], [0], [0], [1], [0, 0, 1, 1], [], []>} : vector<16x32xf32>, vector<32x16xf32>, vector<16x16xf32> -> vector<16x16xf32>
    %257 = vector.broadcast %4 : vector<1x16xf32> to vector<16x16xf32>
    %258 = arith.addf %256, %257 : vector<16x16xf32>
    %c136 = arith.constant 136 : index
    %c0_51 = arith.constant 0 : index
    %259 = vector.load %arg2[%c136, %c0_51] : memref<208x128xf32, #tpu.memory_space<vmem>>, vector<16x48xf32>
    %cst_52 = arith.constant dense<0.000000e+00> : vector<16x48xf32>
    %260 = tpu.matmul %258, %259, %cst_52 {dimension_numbers = #tpu.dot_dimension_numbers<[1], [0], [0], [1], [0, 0, 1, 1], [], []>} : vector<16x16xf32>, vector<16x48xf32>, vector<16x48xf32> -> vector<16x48xf32>
    %261 = vector.broadcast %5 : vector<1x48xf32> to vector<16x48xf32>
    %262 = arith.addf %260, %261 : vector<16x48xf32>
    %cst_53 = arith.constant 0.000000e+00 : f32
    %263 = vector.broadcast %cst_53 : f32 to vector<16x48xf32>
    %264 = arith.maximumf %262, %263 : vector<16x48xf32>
    %c152 = arith.constant 152 : index
    %c0_54 = arith.constant 0 : index
    %265 = vector.load %arg2[%c152, %c0_54] : memref<208x128xf32, #tpu.memory_space<vmem>>, vector<32x8xf32>
    %266 = vector.extract_strided_slice %264 {offsets = [0, 0], sizes = [16, 32], strides = [1, 1]} : vector<16x48xf32> to vector<16x32xf32>
    %cst_55 = arith.constant dense<0.000000e+00> : vector<16x8xf32>
    %267 = tpu.matmul %266, %265, %cst_55 {dimension_numbers = #tpu.dot_dimension_numbers<[1], [0], [0], [1], [0, 0, 1, 1], [], []>} : vector<16x32xf32>, vector<32x8xf32>, vector<16x8xf32> -> vector<16x8xf32>
    %268 = vector.broadcast %6 : vector<1x8xf32> to vector<16x8xf32>
    %269 = arith.addf %267, %268 : vector<16x8xf32>
    %c184 = arith.constant 184 : index
    %c0_56 = arith.constant 0 : index
    %270 = vector.load %arg2[%c184, %c0_56] : memref<208x128xf32, #tpu.memory_space<vmem>>, vector<16x1xf32>
    %271 = vector.extract_strided_slice %264 {offsets = [0, 32], sizes = [16, 16], strides = [1, 1]} : vector<16x48xf32> to vector<16x16xf32>
    %cst_57 = arith.constant dense<0.000000e+00> : vector<16x1xf32>
    %272 = tpu.matmul %271, %270, %cst_57 {dimension_numbers = #tpu.dot_dimension_numbers<[1], [0], [0], [1], [0, 0, 1, 1], [], []>} : vector<16x16xf32>, vector<16x1xf32>, vector<16x1xf32> -> vector<16x1xf32>
    %273 = vector.broadcast %7 : vector<1x1xf32> to vector<16x1xf32>
    %274 = arith.addf %272, %273 : vector<16x1xf32>
    %275 = arith.negf %274 : vector<16x1xf32>
    %276 = math.exp %275 : vector<16x1xf32>
    %cst_58 = arith.constant 1.000000e+00 : f32
    %277 = vector.broadcast %cst_58 : f32 to vector<16x1xf32>
    %278 = arith.addf %277, %276 : vector<16x1xf32>
    %279 = arith.divf %277, %278 : vector<16x1xf32>
    %cst_59 = arith.constant dense<0.000000e+00> : vector<16x16xf32>
    %280 = tpu.matmul %258, %258, %cst_59 {dimension_numbers = #tpu.dot_dimension_numbers<[1], [1], [0], [0], [0, 0, 1, 0], [], []>} : vector<16x16xf32>, vector<16x16xf32>, vector<16x16xf32> -> vector<16x16xf32>
    %281 = arith.negf %280 : vector<16x16xf32>
    %282 = math.exp %281 : vector<16x16xf32>
    %cst_60 = arith.constant 1.000000e+00 : f32
    %283 = vector.broadcast %cst_60 : f32 to vector<16x16xf32>
    %284 = arith.addf %283, %282 : vector<16x16xf32>
    %285 = arith.divf %283, %284 : vector<16x16xf32>
    %cst_61 = arith.constant 0.000000e+00 : f32
    %286 = vector.broadcast %cst_61 : f32 to vector<16x87xf32>
    %287 = tpu.concatenate %258, %269, %285, %279, %286 in 1 : vector<16x16xf32>, vector<16x8xf32>, vector<16x16xf32>, vector<16x1xf32>, vector<16x87xf32> -> vector<16x128xf32>
    %c0_62 = arith.constant 0 : index
    %c0_63 = arith.constant 0 : index
    %288 = vector.load %arg3[%c0_62, %c0_63] : memref<16x128xf32, #tpu.memory_space<vmem>>, vector<16x128xf32>
    tpu.vector_store %arg3[%c0_62, %c0_63], %287 {strides = array<i32>} : memref<16x128xf32, #tpu.memory_space<vmem>>, vector<16x128xf32>,
    return
  }
}

</mosaic_0001>

<bundles_post_ra>
// kernel: forward.1
= control target key start
LH: loop header
LB: loop body
LE: loop exit
PB: predicated region body
PF: predicated region fallthrough
CT: control target
= control target key end

     0   :  { %vm52_vm0 = vcmask 64512   ;;  %v246_v63 = vlaneseq  ;;  %vm411_vm1 = vcmask 261120   ;;  %s3528_s20 = smov 64   ;;  %s3529_s21 = smov 32   ;;  %vm2147_vm2 = vcmask 130048   ;;  %s4039_s2 = inlined_call_operand.vmem [shape: f32[208,128], index: 2, kind: input, shape index: {}]   ;;  %s4040_s1 = inlined_call_operand.vmem [shape: f32[128,8], index: 1, kind: input, shape index: {}]   ;;  %s4041_s0 = inlined_call_operand.vmem [shape: f32[128,128], index: 0, kind: input, shape index: {}]   ;;  %s4042_s3 = inlined_call_operand.vmem [shape: f32[16,128], index: 3, kind: output, shape index: {}]  }
   0x1   :  { %v31_v0 = vld [vmem:[%s4039_s2] sm:$0xff]  ;;  %v37_v2 = vld [vmem:[%s4040_s1 + $0x8] sm:$0xff]  ;;  %v38_v3 = vld [vmem:[%s4040_s1 + $0x10] sm:$0xff]  ;;  %s3530_s19 = smov 96   ;;  %vm2534_vm4 = vcmask 195584   ;;  %vm2537_vm5 = vcmask 326656  }
   0x2   :  { %v36_v1 = vld [vmem:[%s4040_s1] sm:$0xff]  ;;  %2836 = vmatprep.subr.mxu1 %v31_v0  ;;  %v39_v4 = vld [vmem:[%s4040_s1 + $0x18] sm:$0xff]  ;;  %v41_v6 = vld [vmem:[%s4040_s1 + $0x28] sm:$0xff]  ;;  %vm2540_vm6 = vcmask 334848  }
   0x3   :  { %2838 = vmatprep.mubr.msk.f32.mxu1 %vm52_vm0, %v36_v1  ;;  %2837 = vmatpush3.msra.mxu1 %v31_v0  ;;  %v40_v5 = vld [vmem:[%s4040_s1 + $0x20] sm:$0xff]  ;;  %v42_v7 = vld [vmem:[%s4040_s1 + $0x30] sm:$0xff]  ;;  %v43_v8 = vld [vmem:[%s4040_s1 + $0x38] sm:$0xff]  ;;  %v3730_v0 = vshrl.u32 %v246_v63, 7 }
   0x4   :  { %2839 = vmatmul.mubr.msk.f32.vlgmr.msra.gmra.mrb[0].mxu1 %vm52_vm0, %v37_v2  ;;  %v44_v9 = vld [vmem:[%s4040_s1 + $0x40] sm:$0xff]  ;;  %v45_v10 = vld [vmem:[%s4040_s1 + $0x48] sm:$0xff]  ;;  %v46_v11 = vld [vmem:[%s4040_s1 + $0x50] sm:$0xff] }
   0x5   :  { %2841 = vmatprep.mubr.msk.f32.mxu1 %vm52_vm0, %v38_v3  ;;  %v47_v12 = vld [vmem:[%s4040_s1 + $0x58] sm:$0xff]  ;;  %v48_v13 = vld [vmem:[%s4040_s1 + $0x60] sm:$0xff]  ;;  %v49_v14 = vld [vmem:[%s4040_s1 + $0x68] sm:$0xff]  ;;  %v248_v1 = vsub.s32 0, %v3730_v0 }
   0x6   :  { %v50_v15 = vld [vmem:[%s4040_s1 + $0x70] sm:$0xff]  ;;  %v51_v16 = vld [vmem:[%s4040_s1 + $0x78] sm:$0xff]  ;;  %v3624_v17 = vld [vmem:[%s4041_s0] sm:$0xff] }
   0x7   :  { %v32_v18 = vld [vmem:[%s4039_s2 + $0x8] sm:$0xff]  ;;  %v33_v19 = vld [vmem:[%s4039_s2 + $0x10] sm:$0xff]  ;;  %v3648_v47 = vld [vmem:[%s4041_s0 + $0x18] sm:$0xff] }
   0x8   :  { %2842 = vmatmul.mubr.msk.f32.gmra.mrb[2].mxu1 %vm52_vm0, %v39_v4  ;;  %v3201_v20 = vpack.c.bf16 %v33_v19, %v32_v18  ;;  %v3636_v45 = vld [vmem:[%s4041_s0 + $0x8] sm:$0xff]  ;;  %v3641_v46 = vld [vmem:[%s4041_s0 + $0x10] sm:$0xff]  ;;  %v3653_v48 = vld [vmem:[%s4041_s0 + $0x20] sm:$0xff] }
   0x9   :  { %2844 = vmatprep.mubr.msk.f32.mxu1 %vm52_vm0, %v40_v5  ;;  %v3660_v49 = vld [vmem:[%s4041_s0 + $0x28] sm:$0xff]  ;;  %v3665_v50 = vld [vmem:[%s4041_s0 + $0x30] sm:$0xff]  ;;  %v3672_v51 = vld [vmem:[%s4041_s0 + $0x38] sm:$0xff] }
   0xa   :  { %3202 = vmatprep.subr.bf16.mxu0 %v3201_v20  ;;  %v3677_v52 = vld [vmem:[%s4041_s0 + $0x40] sm:$0xff]  ;;  %v3684_v53 = vld [vmem:[%s4041_s0 + $0x48] sm:$0xff]  ;;  %v3689_v54 = vld [vmem:[%s4041_s0 + $0x50] sm:$0xff] }
   0xb   :  { %3204 = vmatpush3.bf16.msra.mxu0 %v3201_v20  ;;  %v3696_v55 = vld [vmem:[%s4041_s0 + $0x58] sm:$0xff]  ;;  %v3701_v56 = vld [vmem:[%s4041_s0 + $0x60] sm:$0xff]  ;;  %v3708_v57 = vld [vmem:[%s4041_s0 + $0x68] sm:$0xff] }
   0xc   :  { %2845 = vmatmul.mubr.msk.f32.gmra.mrb[4].mxu1 %vm52_vm0, %v41_v6  ;;  %v3713_v58 = vld [vmem:[%s4041_s0 + $0x70] sm:$0xff]  ;;  %v3720_v59 = vld [vmem:[%s4041_s0 + $0x78] sm:$0xff]  ;;  %v35_v61 = vld [vmem:[%s4039_s2 + $0x20] sm:$0xff] }
   0xd   :  { %2847 = vmatprep.mubr.msk.f32.mxu1 %vm52_vm0, %v42_v7  ;;  %v34_v60 = vld [vmem:[%s4039_s2 + $0x18] sm:$0xff]  ;;  %v3736_v2 = vld [vmem:[%s4039_s2 + $0xc8] sm:$0xff]  ;;  %vm3338_vm3 = vmpackc.low %vm2147_vm2, %vm2147_vm2 }
   0xe   :  { %v3205_v62 = vpack.c.bf16 %v35_v61, %v34_v60  ;;  %v249_v3 = vrot.slane %v3736_v2, %v248_v1 }
  0x10   :  { %2848 = vmatmul.mubr.msk.f32.gmra.mrb[6].mxu1 %vm52_vm0, %v43_v8  ;;  %3206 = vmatprep.subr.bf16.mxu0 %v3205_v62 }
  0x11   :  { %2850 = vmatprep.mubr.msk.f32.mxu1 %vm52_vm0, %v44_v9  ;;  %3208 = vmatpush3.bf16.msra.mxu0 %v3205_v62 }
  0x14   :  { %2851 = vmatmul.mubr.msk.f32.gmra.mrb[8].mxu1 %vm52_vm0, %v45_v10 }
  0x15   :  { %2853 = vmatprep.mubr.msk.f32.mxu1 %vm52_vm0, %v46_v11 }
  0x18   :  { %2854 = vmatmul.mubr.msk.f32.gmra.mrb[10].mxu1 %vm52_vm0, %v47_v12 }
  0x19   :  { %2856 = vmatprep.mubr.msk.f32.mxu1 %vm52_vm0, %v48_v13 }
  0x1c   :  { %2857 = vmatmul.mubr.msk.f32.gmra.mrb[12].mxu1 %vm52_vm0, %v49_v14 }
  0x1d   :  { %2859 = vmatprep.mubr.msk.f32.mxu1 %vm52_vm0, %v50_v15 }
  0x20   :  { %2860 = vmatmul.mubr.msk.f32.gmra.mrb[14].mxu1 %vm52_vm0, %v51_v16 }
  0x21   :  { %2894 = vmatprep.mubr.f32.mxu1 %v3624_v17 }
  0xd7   :  { %v2840_v21 = vpop.f32.mrb[0].mxu1 }
  0xd8   :  { %v167_v22 = vpop.f32.mrb[1].mxu1 }
  0xd9   :  { %v3169_v23 = vpack.c.bf16 %v2840_v21, %v167_v22 }
  0xdb   :  { %v2843_v24 = vpop.f32.mrb[2].mxu1  ;;  %3170 = vmatprep.subr.bf16.mxu1 %v3169_v23 }
  0xdc   :  { %v177_v25 = vpop.f32.mrb[3].mxu1  ;;  %3172 = vmatpush3.bf16.msra.mxu1 %v3169_v23 }
  0xdd   :  { %v3173_v26 = vpack.c.bf16 %v2843_v24, %v177_v25 }
  0xdf   :  { %v2846_v27 = vpop.f32.mrb[4].mxu1  ;;  %3174 = vmatprep.subr.bf16.mxu1 %v3173_v26 }
  0xe0   :  { %v187_v28 = vpop.f32.mrb[5].mxu1  ;;  %3176 = vmatpush3.bf16.msra.mxu1 %v3173_v26 }
  0xe1   :  { %v3177_v29 = vpack.c.bf16 %v2846_v27, %v187_v28 }
  0xe3   :  { %v2849_v30 = vpop.f32.mrb[6].mxu1  ;;  %3178 = vmatprep.subr.bf16.mxu1 %v3177_v29 }
  0xe4   :  { %v197_v31 = vpop.f32.mrb[7].mxu1  ;;  %3180 = vmatpush3.bf16.msra.mxu1 %v3177_v29 }
  0xe5   :  { %v3181_v32 = vpack.c.bf16 %v2849_v30, %v197_v31 }
  0xe7   :  { %v2852_v33 = vpop.f32.mrb[8].mxu1  ;;  %3182 = vmatprep.subr.bf16.mxu1 %v3181_v32 }
  0xe8   :  { %v207_v34 = vpop.f32.mrb[9].mxu1  ;;  %3184 = vmatpush3.bf16.msra.mxu1 %v3181_v32 }
  0xe9   :  { %v3185_v35 = vpack.c.bf16 %v2852_v33, %v207_v34 }
  0xeb   :  { %v2855_v36 = vpop.f32.mrb[10].mxu1  ;;  %3186 = vmatprep.subr.bf16.mxu1 %v3185_v35 }
  0xec   :  { %v217_v37 = vpop.f32.mrb[11].mxu1  ;;  %3188 = vmatpush3.bf16.msra.mxu1 %v3185_v35 }
  0xed   :  { %v3189_v38 = vpack.c.bf16 %v2855_v36, %v217_v37 }
  0xef   :  { %v2858_v39 = vpop.f32.mrb[12].mxu1  ;;  %3190 = vmatprep.subr.bf16.mxu1 %v3189_v38 }
  0xf0   :  { %v227_v40 = vpop.f32.mrb[13].mxu1  ;;  %3192 = vmatpush3.bf16.msra.mxu1 %v3189_v38 }
  0xf1   :  { %v3193_v41 = vpack.c.bf16 %v2858_v39, %v227_v40 }
  0xf3   :  { %v2861_v42 = vpop.f32.mrb[14].mxu1  ;;  %3194 = vmatprep.subr.bf16.mxu1 %v3193_v41 }
  0xf4   :  { %v237_v43 = vpop.f32.mrb[15].mxu1  ;;  %3196 = vmatpush3.bf16.msra.mxu1 %v3193_v41 }
  0xf5   :  { %v3197_v44 = vpack.c.bf16 %v2861_v42, %v237_v43 }
  0xf7   :  { %3198 = vmatprep.subr.bf16.mxu1 %v3197_v44 }
  0xf8   :  { %3200 = vmatpush3.bf16.msra.mxu1 %v3197_v44 }
  0xfb   :  { %2895 = vmatmul.mubr.f32.vlgmr.msra.gmra.mrb[16].mxu1 %v3636_v45 }
  0xfc   :  { %2897 = vmatprep.mubr.f32.mxu1 %v3641_v46 }
  0xff   :  { %2898 = vmatmul.mubr.f32.gmra.mrb[18].mxu1 %v3648_v47 }
 0x100   :  { %2900 = vmatprep.mubr.f32.mxu1 %v3653_v48 }
 0x103   :  { %2901 = vmatmul.mubr.f32.gmra.mrb[20].mxu1 %v3660_v49 }
 0x104   :  { %2903 = vmatprep.mubr.f32.mxu1 %v3665_v50 }
 0x107   :  { %2904 = vmatmul.mubr.f32.gmra.mrb[22].mxu1 %v3672_v51 }
 0x108   :  { %2906 = vmatprep.mubr.f32.mxu1 %v3677_v52 }
 0x10b   :  { %2907 = vmatmul.mubr.f32.gmra.mrb[24].mxu1 %v3684_v53 }
 0x10c   :  { %2909 = vmatprep.mubr.f32.mxu1 %v3689_v54 }
 0x10f   :  { %2910 = vmatmul.mubr.f32.gmra.mrb[26].mxu1 %v3696_v55 }
 0x110   :  { %2912 = vmatprep.mubr.f32.mxu1 %v3701_v56 }
 0x113   :  { %2913 = vmatmul.mubr.f32.gmra.mrb[28].mxu1 %v3708_v57 }
 0x114   :  { %2915 = vmatprep.mubr.f32.mxu1 %v3713_v58 }
 0x117   :  { %2916 = vmatmul.mubr.f32.gmra.mrb[30].mxu1 %v3720_v59 }
 0x118   :  { %2982 = vmatprep.mubr.f32.mxu1 %v3624_v17 }
 0x1ce   :  { %v2896_v4 = vpop.f32.mrb[16].mxu1 }
 0x1cf   :  { %v322_v5 = vadd.f32 %v2896_v4, %v249_v3  ;;  %v316_v6 = vpop.f32.mrb[17].mxu1 }
 0x1d0   :  { %v317_v7 = vadd.f32 %v316_v6, %v249_v3  ;;  %v770_v6 = vld [vmem:[%s4039_s2 + $0x28] sm:$0xff] }
 0x1d1   :  { %v396_v10 = vmax.f32 %v322_v5, 0.0 }
 0x1d2   :  { %v395_v8 = vmax.f32 %v317_v7, 0.0  ;;  %v2899_v9 = vpop.f32.mrb[18].mxu1  ;;  %v771_v7 = vld [vmem:[%s4039_s2 + $0x30] sm:$0xff] }
 0x1d3   :  { %v332_v11 = vadd.f32 %v2899_v9, %v249_v3  ;;  %v326_v12 = vpop.f32.mrb[19].mxu1  ;;  %v773_v9 = vld [vmem:[%s4039_s2 + $0x40] sm:$0xff] }
 0x1d4   :  { %v327_v13 = vadd.f32 %v326_v12, %v249_v3  ;;  %2926 = vmatprep.mubr.msk.f32.mxu0 %vm411_vm1, %v395_v8  ;;  %v3241_v8 = vpack.c.bf16 %v771_v7, %v770_v6 }
 0x1d5   :  { %2927 = vmatmul.mubr.msk.f32.vlgmr.msra.gmra.mrb[0].mxu0 %vm411_vm1, %v396_v10  ;;  %v398_v16 = vmax.f32 %v332_v11, 0.0 }
 0x1d6   :  { %v397_v14 = vmax.f32 %v327_v13, 0.0  ;;  %v2902_v15 = vpop.f32.mrb[20].mxu1  ;;  %3242 = vmatprep.subr.bf16.mxu0 %v3241_v8 }
 0x1d7   :  { %v342_v17 = vadd.f32 %v2902_v15, %v249_v3  ;;  %v336_v18 = vpop.f32.mrb[21].mxu1  ;;  %3244 = vmatpush3.bf16.msra.mxu0 %v3241_v8 }
 0x1d8   :  { %v337_v19 = vadd.f32 %v336_v18, %v249_v3  ;;  %2929 = vmatprep.mubr.msk.f32.mxu0 %vm411_vm1, %v397_v14 }
 0x1d9   :  { %2930 = vmatmul.mubr.msk.f32.gmra.mrb[2].mxu0 %vm411_vm1, %v398_v16  ;;  %v400_v22 = vmax.f32 %v342_v17, 0.0 }
 0x1da   :  { %v399_v20 = vmax.f32 %v337_v19, 0.0  ;;  %v2905_v21 = vpop.f32.mrb[22].mxu1 }
 0x1db   :  { %v352_v23 = vadd.f32 %v2905_v21, %v249_v3  ;;  %v346_v24 = vpop.f32.mrb[23].mxu1 }
 0x1dc   :  { %v347_v25 = vadd.f32 %v346_v24, %v249_v3  ;;  %2932 = vmatprep.mubr.msk.f32.mxu0 %vm411_vm1, %v399_v20 }
 0x1dd   :  { %2933 = vmatmul.mubr.msk.f32.gmra.mrb[4].mxu0 %vm411_vm1, %v400_v22  ;;  %v402_v28 = vmax.f32 %v352_v23, 0.0 }
 0x1de   :  { %v401_v26 = vmax.f32 %v347_v25, 0.0  ;;  %v2908_v27 = vpop.f32.mrb[24].mxu1 }
 0x1df   :  { %v362_v29 = vadd.f32 %v2908_v27, %v249_v3  ;;  %v356_v30 = vpop.f32.mrb[25].mxu1 }
 0x1e0   :  { %v357_v31 = vadd.f32 %v356_v30, %v249_v3  ;;  %2935 = vmatprep.mubr.msk.f32.mxu0 %vm411_vm1, %v401_v26 }
 0x1e1   :  { %2936 = vmatmul.mubr.msk.f32.gmra.mrb[6].mxu0 %vm411_vm1, %v402_v28  ;;  %v404_v34 = vmax.f32 %v362_v29, 0.0 }
 0x1e2   :  { %v403_v32 = vmax.f32 %v357_v31, 0.0  ;;  %v2911_v33 = vpop.f32.mrb[26].mxu1 }
 0x1e3   :  { %v372_v35 = vadd.f32 %v2911_v33, %v249_v3  ;;  %v366_v36 = vpop.f32.mrb[27].mxu1 }
 0x1e4   :  { %v367_v37 = vadd.f32 %v366_v36, %v249_v3  ;;  %2938 = vmatprep.mubr.msk.f32.mxu0 %vm411_vm1, %v403_v32 }
 0x1e5   :  { %2939 = vmatmul.mubr.msk.f32.gmra.mrb[8].mxu0 %vm411_vm1, %v404_v34  ;;  %v406_v40 = vmax.f32 %v372_v35, 0.0 }
 0x1e6   :  { %v405_v38 = vmax.f32 %v367_v37, 0.0  ;;  %v2914_v39 = vpop.f32.mrb[28].mxu1 }
 0x1e7   :  { %v382_v41 = vadd.f32 %v2914_v39, %v249_v3  ;;  %v376_v42 = vpop.f32.mrb[29].mxu1 }
 0x1e8   :  { %v377_v43 = vadd.f32 %v376_v42, %v249_v3  ;;  %2941 = vmatprep.mubr.msk.f32.mxu0 %vm411_vm1, %v405_v38 }
 0x1e9   :  { %2942 = vmatmul.mubr.msk.f32.gmra.mrb[10].mxu0 %vm411_vm1, %v406_v40  ;;  %v408_v61 = vmax.f32 %v382_v41, 0.0 }
 0x1ea   :  { %v407_v44 = vmax.f32 %v377_v43, 0.0  ;;  %v2917_v60 = vpop.f32.mrb[30].mxu1 }
 0x1eb   :  { %v392_v62 = vadd.f32 %v2917_v60, %v249_v3  ;;  %v386_v63 = vpop.f32.mrb[31].mxu1 }
 0x1ec   :  { %v387_v1 = vadd.f32 %v386_v63, %v249_v3  ;;  %2944 = vmatprep.mubr.msk.f32.mxu0 %vm411_vm1, %v407_v44  ;;  %v772_v3 = vld [vmem:[%s4039_s2 + $0x38] sm:$0xff] }
 0x1ed   :  { %2945 = vmatmul.mubr.msk.f32.gmra.mrb[12].mxu0 %vm411_vm1, %v408_v61  ;;  %v410_v5 = vmax.f32 %v392_v62, 0.0  ;;  %v3245_v10 = vpack.c.bf16 %v773_v9, %v772_v3 }
 0x1ee   :  { %v409_v4 = vmax.f32 %v387_v1, 0.0 }
 0x1ef   :  { %3246 = vmatprep.subr.bf16.mxu0 %v3245_v10 }
 0x1f0   :  { %2947 = vmatprep.mubr.msk.f32.mxu0 %vm411_vm1, %v409_v4  ;;  %3248 = vmatpush3.bf16.msra.mxu0 %v3245_v10 }
 0x1f1   :  { %2948 = vmatmul.mubr.msk.f32.gmra.mrb[14].mxu0 %vm411_vm1, %v410_v5 }
 0x2a8   :  { %v2928_v11 = vpop.f32.mrb[0].mxu0 }
 0x2a9   :  { %v526_v12 = vpop.f32.mrb[1].mxu0 }
 0x2aa   :  { %v3209_v13 = vpack.c.bf16 %v2928_v11, %v526_v12 }
 0x2ac   :  { %v2931_v14 = vpop.f32.mrb[2].mxu0  ;;  %3210 = vmatprep.subr.bf16.mxu1 %v3209_v13 }
 0x2ad   :  { %v536_v15 = vpop.f32.mrb[3].mxu0  ;;  %3212 = vmatpush3.bf16.msra.mxu1 %v3209_v13 }
 0x2ae   :  { %v3213_v16 = vpack.c.bf16 %v2931_v14, %v536_v15 }
 0x2b0   :  { %v2934_v17 = vpop.f32.mrb[4].mxu0  ;;  %3214 = vmatprep.subr.bf16.mxu1 %v3213_v16 }
 0x2b1   :  { %v546_v18 = vpop.f32.mrb[5].mxu0  ;;  %3216 = vmatpush3.bf16.msra.mxu1 %v3213_v16 }
 0x2b2   :  { %v3217_v19 = vpack.c.bf16 %v2934_v17, %v546_v18 }
 0x2b4   :  { %v2937_v20 = vpop.f32.mrb[6].mxu0  ;;  %3218 = vmatprep.subr.bf16.mxu1 %v3217_v19 }
 0x2b5   :  { %v556_v21 = vpop.f32.mrb[7].mxu0  ;;  %3220 = vmatpush3.bf16.msra.mxu1 %v3217_v19 }
 0x2b6   :  { %v3221_v22 = vpack.c.bf16 %v2937_v20, %v556_v21 }
 0x2b8   :  { %v2940_v23 = vpop.f32.mrb[8].mxu0  ;;  %3222 = vmatprep.subr.bf16.mxu1 %v3221_v22 }
 0x2b9   :  { %v566_v24 = vpop.f32.mrb[9].mxu0  ;;  %3224 = vmatpush3.bf16.msra.mxu1 %v3221_v22 }
 0x2ba   :  { %v3225_v25 = vpack.c.bf16 %v2940_v23, %v566_v24 }
 0x2bc   :  { %v2943_v26 = vpop.f32.mrb[10].mxu0  ;;  %3226 = vmatprep.subr.bf16.mxu1 %v3225_v25 }
 0x2bd   :  { %v576_v27 = vpop.f32.mrb[11].mxu0  ;;  %3228 = vmatpush3.bf16.msra.mxu1 %v3225_v25 }
 0x2be   :  { %v3229_v28 = vpack.c.bf16 %v2943_v26, %v576_v27 }
 0x2c0   :  { %v2946_v29 = vpop.f32.mrb[12].mxu0  ;;  %3230 = vmatprep.subr.bf16.mxu1 %v3229_v28 }
 0x2c1   :  { %v586_v30 = vpop.f32.mrb[13].mxu0  ;;  %3232 = vmatpush3.bf16.msra.mxu1 %v3229_v28 }
 0x2c2   :  { %v3233_v31 = vpack.c.bf16 %v2946_v29, %v586_v30  ;;  %v3527_v29 = vmov 0.0   ;;  %v780_v30 = vsub.s32 2, %v3730_v0 }
 0x2c4   :  { %v2949_v32 = vpop.f32.mrb[14].mxu0  ;;  %3234 = vmatprep.subr.bf16.mxu1 %v3233_v31 }
 0x2c5   :  { %v596_v33 = vpop.f32.mrb[15].mxu0  ;;  %3236 = vmatpush3.bf16.msra.mxu1 %v3233_v31  ;;  %v3845_v31 = vrot.slane %v3736_v2, %v780_v30 }
 0x2c6   :  { %v3237_v34 = vpack.c.bf16 %v2949_v32, %v596_v33 }
 0x2c8   :  { %3238 = vmatprep.subr.bf16.mxu1 %v3237_v34 }
 0x2c9   :  { %3240 = vmatpush3.bf16.msra.mxu1 %v3237_v34 }
 0x2cc   :  { %2983 = vmatmul.mubr.f32.vlgmr.msra.gmra.mrb[32].mxu1 %v3636_v45  ;;  %v774_v45 = vld [vmem:[%s4039_s2 + $0x48] sm:$0xff] }
 0x2cd   :  { %2985 = vmatprep.mubr.f32.mxu1 %v3641_v46  ;;  %v775_v46 = vld [vmem:[%s4039_s2 + $0x50] sm:$0xff] }
 0x2d0   :  { %2986 = vmatmul.mubr.f32.gmra.mrb[34].mxu1 %v3648_v47  ;;  %v3788_v47 = vpack.c.bf16 %v775_v46, %v774_v45 }
 0x2d1   :  { %2988 = vmatprep.mubr.f32.mxu1 %v3653_v48  ;;  %v607_v48 = vsub.s32 1, %v3730_v0 }
 0x2d2   :  { %3250 = vmatprep.subr.bf16.mxu0 %v3788_v47 }
 0x2d4   :  { %2989 = vmatmul.mubr.f32.gmra.mrb[36].mxu1 %v3660_v49  ;;  %v3793_v49 = vrot.slane %v3736_v2, %v607_v48 }
 0x2d5   :  { %2991 = vmatprep.mubr.f32.mxu1 %v3665_v50 }
 0x2d8   :  { %2992 = vmatmul.mubr.f32.gmra.mrb[38].mxu1 %v3672_v51 }
 0x2d9   :  { %2994 = vmatprep.mubr.f32.mxu1 %v3677_v52 }
 0x2dc   :  { %2995 = vmatmul.mubr.f32.gmra.mrb[40].mxu1 %v3684_v53 }
 0x2dd   :  { %2997 = vmatprep.mubr.f32.mxu1 %v3689_v54  ;;  %v776_v54 = vld [vmem:[%s4039_s2 + $0x58] sm:$0xff] }
 0x2e0   :  { %2998 = vmatmul.mubr.f32.gmra.mrb[42].mxu1 %v3696_v55  ;;  %v777_v55 = vld [vmem:[%s4039_s2 + $0x60] sm:$0xff] }
 0x2e1   :  { %3000 = vmatprep.mubr.f32.mxu1 %v3701_v56  ;;  %v3804_v36 = vpack.c.bf16 %v777_v55, %v776_v54 }
 0x2e4   :  { %3001 = vmatmul.mubr.f32.gmra.mrb[44].mxu1 %v3708_v57 }
 0x2e5   :  { %3003 = vmatprep.mubr.f32.mxu1 %v3713_v58 }
 0x2e8   :  { %3004 = vmatmul.mubr.f32.gmra.mrb[46].mxu1 %v3720_v59 }
 0x39f   :  { %v2984_v50 = vpop.f32.mrb[32].mxu1 }
 0x3a0   :  { %v681_v51 = vadd.f32 %v2984_v50, %v3793_v49  ;;  %v675_v52 = vpop.f32.mrb[33].mxu1 }
 0x3a1   :  { %v676_v53 = vadd.f32 %v675_v52, %v3793_v49 }
 0x3a2   :  { %v755_v58 = vmax.f32 %v681_v51, 0.0 }
 0x3a3   :  { %v754_v56 = vmax.f32 %v676_v53, 0.0  ;;  %v2987_v57 = vpop.f32.mrb[34].mxu1 }
 0x3a4   :  { %v691_v59 = vadd.f32 %v2987_v57, %v3793_v49  ;;  %v685_v35 = vpop.f32.mrb[35].mxu1 }
 0x3a5   :  { %v686_v37 = vadd.f32 %v685_v35, %v3793_v49  ;;  %3014 = vmatprep.mubr.msk.f32.mxu0 %vm411_vm1, %v754_v56 }
 0x3a6   :  { %3015 = vmatmul.mubr.msk.f32.vlgmr.msra.gmra.mrb[16].mxu0 %vm411_vm1, %v755_v58  ;;  %v757_v40 = vmax.f32 %v691_v59, 0.0 }
 0x3a7   :  { %v756_v38 = vmax.f32 %v686_v37, 0.0  ;;  %v2990_v39 = vpop.f32.mrb[36].mxu1  ;;  %3252 = vmatpush3.bf16.msra.mxu0 %v3788_v47 }
 0x3a8   :  { %v701_v41 = vadd.f32 %v2990_v39, %v3793_v49  ;;  %v695_v42 = vpop.f32.mrb[37].mxu1  ;;  %3254 = vmatprep.subr.bf16.mxu0 %v3804_v36 }
 0x3a9   :  { %v696_v43 = vadd.f32 %v695_v42, %v3793_v49  ;;  %3017 = vmatprep.mubr.msk.f32.mxu0 %vm411_vm1, %v756_v38 }
 0x3aa   :  { %3018 = vmatmul.mubr.msk.f32.gmra.mrb[18].mxu0 %vm411_vm1, %v757_v40  ;;  %v759_v61 = vmax.f32 %v701_v41, 0.0 }
 0x3ab   :  { %v758_v44 = vmax.f32 %v696_v43, 0.0  ;;  %v2993_v60 = vpop.f32.mrb[38].mxu1  ;;  %3256 = vmatpush3.bf16.msra.mxu0 %v3804_v36 }
 0x3ac   :  { %v711_v62 = vadd.f32 %v2993_v60, %v3793_v49  ;;  %v705_v63 = vpop.f32.mrb[39].mxu1  ;;  %3258 = vmatprep.subr.bf16.mxu0 %v3788_v47 }
 0x3ad   :  { %v706_v1 = vadd.f32 %v705_v63, %v3793_v49  ;;  %3020 = vmatprep.mubr.msk.f32.mxu0 %vm411_vm1, %v758_v44 }
 0x3ae   :  { %3021 = vmatmul.mubr.msk.f32.gmra.mrb[20].mxu0 %vm411_vm1, %v759_v61  ;;  %v761_v6 = vmax.f32 %v711_v62, 0.0 }
 0x3af   :  { %v760_v4 = vmax.f32 %v706_v1, 0.0  ;;  %v2996_v5 = vpop.f32.mrb[40].mxu1 }
 0x3b0   :  { %v721_v7 = vadd.f32 %v2996_v5, %v3793_v49  ;;  %v715_v3 = vpop.f32.mrb[41].mxu1 }
 0x3b1   :  { %v716_v8 = vadd.f32 %v715_v3, %v3793_v49  ;;  %3023 = vmatprep.mubr.msk.f32.mxu0 %vm411_vm1, %v760_v4 }
 0x3b2   :  { %3024 = vmatmul.mubr.msk.f32.gmra.mrb[22].mxu0 %vm411_vm1, %v761_v6  ;;  %v763_v11 = vmax.f32 %v721_v7, 0.0 }
 0x3b3   :  { %v762_v9 = vmax.f32 %v716_v8, 0.0  ;;  %v2999_v10 = vpop.f32.mrb[42].mxu1 }
 0x3b4   :  { %v731_v12 = vadd.f32 %v2999_v10, %v3793_v49  ;;  %v725_v13 = vpop.f32.mrb[43].mxu1 }
 0x3b5   :  { %v726_v14 = vadd.f32 %v725_v13, %v3793_v49  ;;  %3026 = vmatprep.mubr.msk.f32.mxu0 %vm411_vm1, %v762_v9 }
 0x3b6   :  { %3027 = vmatmul.mubr.msk.f32.gmra.mrb[24].mxu0 %vm411_vm1, %v763_v11  ;;  %v765_v17 = vmax.f32 %v731_v12, 0.0 }
 0x3b7   :  { %v764_v15 = vmax.f32 %v726_v14, 0.0  ;;  %v3002_v16 = vpop.f32.mrb[44].mxu1 }
 0x3b8   :  { %v741_v18 = vadd.f32 %v3002_v16, %v3793_v49  ;;  %v735_v19 = vpop.f32.mrb[45].mxu1 }
 0x3b9   :  { %v736_v20 = vadd.f32 %v735_v19, %v3793_v49  ;;  %3029 = vmatprep.mubr.msk.f32.mxu0 %vm411_vm1, %v764_v15 }
 0x3ba   :  { %3030 = vmatmul.mubr.msk.f32.gmra.mrb[26].mxu0 %vm411_vm1, %v765_v17  ;;  %v767_v23 = vmax.f32 %v741_v18, 0.0 }
 0x3bb   :  { %v766_v21 = vmax.f32 %v736_v20, 0.0  ;;  %v3005_v22 = vpop.f32.mrb[46].mxu1 }
 0x3bc   :  { %v751_v24 = vadd.f32 %v3005_v22, %v3793_v49  ;;  %v745_v25 = vpop.f32.mrb[47].mxu1 }
 0x3bd   :  { %v746_v26 = vadd.f32 %v745_v25, %v3793_v49  ;;  %3032 = vmatprep.mubr.msk.f32.mxu0 %vm411_vm1, %v766_v21 }
 0x3be   :  { %3033 = vmatmul.mubr.msk.f32.gmra.mrb[28].mxu0 %vm411_vm1, %v767_v23  ;;  %v769_v28 = vmax.f32 %v751_v24, 0.0 }
 0x3bf   :  { %v768_v27 = vmax.f32 %v746_v26, 0.0 }
 0x3c1   :  { %3035 = vmatprep.mubr.msk.f32.mxu0 %vm411_vm1, %v768_v27 }
 0x3c2   :  { %3036 = vmatmul.mubr.msk.f32.gmra.mrb[30].mxu0 %vm411_vm1, %v769_v28 }
 0x3c3   :  { %3046 = vmatprep.mubr.f32.mxu0 %v3527_v29 }
 0x3c6   :  { %3047 = vmatmul.mubr.f32.vlgmr.msra.gmra.mrb[16].mxu0 %v3527_v29 }
 0x3c7   :  { %3260 = vmatpush3.bf16.msra.mxu0 %v3788_v47 }
 0x3c8   :  { %3262 = vmatprep.subr.bf16.mxu0 %v3804_v36 }
 0x3cb   :  { %3264 = vmatpush3.bf16.msra.mxu0 %v3804_v36 }
 0x3cc   :  { %3266 = vmatprep.subr.bf16.mxu0 %v3788_v47 }
 0x499   :  { %v3048_v32 = vpop.f32.mrb[16].mxu0 }
 0x49a   :  { %v1044_v33 = vpop.f32.mrb[17].mxu0  ;;  %v3343_v45 = vadd.f32 %v3048_v32, %v3845_v31 }
 0x49b   :  { %v3344_v34 = vadd.f32 %v1044_v33, %v3845_v31 }
 0x49c   :  { %v2598_v50 = vmul.f32 -1.442695, %v3343_v45 }
 0x49d   :  { %3382 = vtanh.f32 %v3344_v34  ;;  %v2597_v49 = vmul.f32 -1.442695, %v3344_v34 }
 0x49e   :  { %3384 = vtanh.f32 %v3343_v45 }
 0x49f   :  { %3386 = vpow2.f32 %v2597_v49 }
 0x4a0   :  { %3388 = vpow2.f32 %v2598_v50 }
 0x4a7   :  { %v3383_v46 = vpop.eup %3382 }
 0x4a8   :  { %1073 = vrot.lane.b32.xlu0 %v3383_v46, %s3528_s20  ;;  %v3385_v48 = vpop.eup %3384 }
 0x4a9   :  { %v3387_v2 = vpop.eup %3386 }
 0x4aa   :  { %v1061_v51 = vadd.f32 1.0, %v3387_v2  ;;  %v3389_v52 = vpop.eup %3388 }
 0x4ab   :  { %v1062_v53 = vadd.f32 1.0, %v3389_v52 }
 0x4ac   :  { %1075 = vrot.lane.b32.xlu0 %v3385_v48, %s3528_s20  ;;  %3390 = vrcp.f32 %v1061_v51 }
 0x4ad   :  { %3392 = vrcp.f32 %v1062_v53 }
 0x4b6   :  { %v3391_v54 = vpop.eup %3390 }
 0x4b7   :  { %v3393_v57 = vpop.eup %3392  ;;  %v1069_v35 = vmul.f32 0.0, %v3391_v54 }
 0x4b8   :  { %v1070_v39 = vmul.f32 0.0, %v3393_v57 }
 0x51a   :  { %v1074_v55 = vpop.permute.xlu0 %1073 }
 0x51b   :  { %v1079_v56 = vmul.f32 %v3391_v54, %v1074_v55 }
 0x51d   :  { %1083 = vrot.lane.b32.xlu1 %v1079_v56, %s3529_s21 }
 0x51e   :  { %v1076_v58 = vpop.permute.xlu0 %1075 }
 0x51f   :  { %v1080_v59 = vmul.f32 %v3393_v57, %v1076_v58 }
 0x521   :  { %1085 = vrot.lane.b32.xlu1 %v1080_v59, %s3529_s21 }
 0x58f   :  { %v1084_v37 = vpop.permute.xlu1 %1083 }
 0x590   :  { %v1089_v38 = vadd.f32 %v1084_v37, %v1069_v35 }
 0x592   :  { %3394 = vtanh.f32 %v1089_v38 }
 0x593   :  { %v1086_v40 = vpop.permute.xlu1 %1085 }
 0x594   :  { %v1090_v41 = vadd.f32 %v1086_v40, %v1070_v39 }
 0x596   :  { %3396 = vtanh.f32 %v1090_v41 }
 0x59c   :  { %v3395_v42 = vpop.eup %3394 }
 0x59d   :  { %1095 = vrot.lane.b32.xlu0 %v3395_v42, %s3528_s20 }
 0x5a0   :  { %v3397_v43 = vpop.eup %3396 }
 0x5a1   :  { %1097 = vrot.lane.b32.xlu1 %v3397_v43, %s3528_s20 }
 0x60f   :  { %v1096_v44 = vpop.permute.xlu0 %1095 }
 0x610   :  { %v1101_v60 = vmul.f32 %v3391_v54, %v1096_v44 }
 0x612   :  { %1105 = vrot.lane.b32.xlu0 %v1101_v60, %s3529_s21 }
 0x613   :  { %v1098_v61 = vpop.permute.xlu1 %1097 }
 0x614   :  { %v1102_v62 = vmul.f32 %v3393_v57, %v1098_v61 }
 0x616   :  { %1107 = vrot.lane.b32.xlu1 %v1102_v62, %s3529_s21 }
 0x684   :  { %v1106_v63 = vpop.permute.xlu0 %1105 }
 0x685   :  { %3057 = vmatprep.mubr.msk.f32.mxu0 %vm411_vm1, %v1106_v63 }
 0x688   :  { %v1108_v1 = vpop.permute.xlu1 %1107 }
 0x689   :  { %3058 = vmatmul.mubr.msk.f32.vlgmr.msra.gmra.mrb[18].mxu0 %vm411_vm1, %v1108_v1 }
 0x68a   :  { %3268 = vmatpush3.bf16.msra.mxu0 %v3788_v47 }
 0x68b   :  { %3270 = vmatprep.subr.bf16.mxu0 %v3804_v36 }
 0x68e   :  { %3272 = vmatpush3.bf16.msra.mxu0 %v3804_v36 }
 0x68f   :  { %3274 = vmatprep.subr.bf16.mxu0 %v3788_v47 }
 0x75c   :  { %v3059_v4 = vpop.f32.mrb[18].mxu0 }
 0x75d   :  { %v3345_v5 = vadd.f32 %v3059_v4, %v3845_v31  ;;  %v1179_v6 = vpop.f32.mrb[19].mxu0 }
 0x75e   :  { %v3346_v7 = vadd.f32 %v1179_v6, %v3845_v31 }
 0x75f   :  { %3398 = vtanh.f32 %v3345_v5  ;;  %v2602_v9 = vmul.f32 -1.442695, %v3345_v5 }
 0x760   :  { %3400 = vtanh.f32 %v3346_v7  ;;  %v2601_v10 = vmul.f32 -1.442695, %v3346_v7 }
 0x761   :  { %3402 = vpow2.f32 %v2602_v9 }
 0x762   :  { %3404 = vpow2.f32 %v2601_v10 }
 0x769   :  { %v3399_v3 = vpop.eup %3398 }
 0x76a   :  { %v3401_v8 = vpop.eup %3400  ;;  %1210 = vrot.lane.b32.xlu1 %v3399_v3, %s3528_s20 }
 0x76b   :  { %1208 = vrot.lane.b32.xlu0 %v3401_v8, %s3528_s20  ;;  %v3403_v11 = vpop.eup %3402 }
 0x76c   :  { %v3405_v12 = vpop.eup %3404  ;;  %v1197_v13 = vadd.f32 1.0, %v3403_v11 }
 0x76d   :  { %v1196_v14 = vadd.f32 1.0, %v3405_v12 }
 0x76e   :  { %3406 = vrcp.f32 %v1197_v13 }
 0x76f   :  { %3408 = vrcp.f32 %v1196_v14 }
 0x778   :  { %v3407_v15 = vpop.eup %3406 }
 0x779   :  { %v3409_v17 = vpop.eup %3408  ;;  %v1205_v21 = vmul.f32 %v3407_v15, %v1090_v41 }
 0x77a   :  { %v1204_v23 = vmul.f32 %v3409_v17, %v1089_v38 }
 0x7dc   :  { %v1211_v16 = vpop.permute.xlu1 %1210 }
 0x7dd   :  { %v1215_v18 = vmul.f32 %v3407_v15, %v1211_v16  ;;  %v1209_v19 = vpop.permute.xlu0 %1208 }
 0x7de   :  { %v1214_v20 = vmul.f32 %v3409_v17, %v1209_v19 }
 0x7df   :  { %1220 = vrot.lane.b32.xlu1 %v1215_v18, %s3529_s21 }
 0x7e0   :  { %1218 = vrot.lane.b32.xlu0 %v1214_v20, %s3529_s21 }
 0x851   :  { %v1221_v22 = vpop.permute.xlu1 %1220 }
 0x852   :  { %v1225_v24 = vadd.f32 %v1221_v22, %v1205_v21  ;;  %v1219_v25 = vpop.permute.xlu0 %1218 }
 0x853   :  { %v1224_v26 = vadd.f32 %v1219_v25, %v1204_v23 }
 0x854   :  { %3410 = vtanh.f32 %v1225_v24 }
 0x855   :  { %3412 = vtanh.f32 %v1224_v26 }
 0x85e   :  { %v3411_v27 = vpop.eup %3410 }
 0x85f   :  { %v3413_v28 = vpop.eup %3412  ;;  %1232 = vrot.lane.b32.xlu1 %v3411_v27, %s3528_s20 }
 0x860   :  { %1230 = vrot.lane.b32.xlu0 %v3413_v28, %s3528_s20 }
 0x8d1   :  { %v1233_v29 = vpop.permute.xlu1 %1232 }
 0x8d2   :  { %v1237_v30 = vmul.f32 %v3407_v15, %v1233_v29  ;;  %v1231_v32 = vpop.permute.xlu0 %1230 }
 0x8d3   :  { %v1236_v33 = vmul.f32 %v3409_v17, %v1231_v32 }
 0x8d4   :  { %1242 = vrot.lane.b32.xlu1 %v1237_v30, %s3529_s21 }
 0x8d5   :  { %1240 = vrot.lane.b32.xlu0 %v1236_v33, %s3529_s21 }
 0x946   :  { %v1243_v45 = vpop.permute.xlu1 %1242 }
 0x947   :  { %v1241_v34 = vpop.permute.xlu0 %1240 }
 0x948   :  { %3068 = vmatprep.mubr.msk.f32.mxu0 %vm411_vm1, %v1241_v34 }
 0x949   :  { %3069 = vmatmul.mubr.msk.f32.vlgmr.msra.gmra.mrb[20].mxu0 %vm411_vm1, %v1243_v45 }
 0x94a   :  { %3276 = vmatpush3.bf16.msra.mxu0 %v3788_v47 }
 0x94b   :  { %3278 = vmatprep.subr.bf16.mxu0 %v3804_v36 }
 0x94e   :  { %3280 = vmatpush3.bf16.msra.mxu0 %v3804_v36 }
 0x94f   :  { %3282 = vmatprep.subr.bf16.mxu0 %v3788_v47 }
 0xa1c   :  { %v3070_v46 = vpop.f32.mrb[20].mxu0 }
 0xa1d   :  { %v3347_v48 = vadd.f32 %v3070_v46, %v3845_v31  ;;  %v1314_v49 = vpop.f32.mrb[21].mxu0 }
 0xa1e   :  { %v3348_v50 = vadd.f32 %v1314_v49, %v3845_v31 }
 0xa1f   :  { %3414 = vtanh.f32 %v3347_v48  ;;  %v2606_v52 = vmul.f32 -1.442695, %v3347_v48 }
 0xa20   :  { %3416 = vtanh.f32 %v3348_v50  ;;  %v2605_v53 = vmul.f32 -1.442695, %v3348_v50 }
 0xa21   :  { %3418 = vpow2.f32 %v2606_v52 }
 0xa22   :  { %3420 = vpow2.f32 %v2605_v53 }
 0xa29   :  { %v3415_v2 = vpop.eup %3414 }
 0xa2a   :  { %v3417_v51 = vpop.eup %3416  ;;  %1345 = vrot.lane.b32.xlu1 %v3415_v2, %s3528_s20 }
 0xa2b   :  { %1343 = vrot.lane.b32.xlu0 %v3417_v51, %s3528_s20  ;;  %v3419_v54 = vpop.eup %3418 }
 0xa2c   :  { %v3421_v55 = vpop.eup %3420  ;;  %v1332_v56 = vadd.f32 1.0, %v3419_v54 }
 0xa2d   :  { %v1331_v57 = vadd.f32 1.0, %v3421_v55 }
 0xa2e   :  { %3422 = vrcp.f32 %v1332_v56 }
 0xa2f   :  { %3424 = vrcp.f32 %v1331_v57 }
 0xa38   :  { %v3423_v58 = vpop.eup %3422 }
 0xa39   :  { %v3425_v35 = vpop.eup %3424  ;;  %v1340_v40 = vmul.f32 %v3423_v58, %v1225_v24 }
 0xa3a   :  { %v1339_v42 = vmul.f32 %v3425_v35, %v1224_v26 }
 0xa9c   :  { %v1346_v59 = vpop.permute.xlu1 %1345 }
 0xa9d   :  { %v1350_v37 = vmul.f32 %v3423_v58, %v1346_v59  ;;  %v1344_v38 = vpop.permute.xlu0 %1343 }
 0xa9e   :  { %v1349_v39 = vmul.f32 %v3425_v35, %v1344_v38 }
 0xa9f   :  { %1355 = vrot.lane.b32.xlu1 %v1350_v37, %s3529_s21 }
 0xaa0   :  { %1353 = vrot.lane.b32.xlu0 %v1349_v39, %s3529_s21 }
 0xb11   :  { %v1356_v41 = vpop.permute.xlu1 %1355 }
 0xb12   :  { %v1360_v43 = vadd.f32 %v1356_v41, %v1340_v40  ;;  %v1354_v44 = vpop.permute.xlu0 %1353 }
 0xb13   :  { %v1359_v60 = vadd.f32 %v1354_v44, %v1339_v42 }
 0xb14   :  { %3426 = vtanh.f32 %v1360_v43 }
 0xb15   :  { %3428 = vtanh.f32 %v1359_v60 }
 0xb1e   :  { %v3427_v61 = vpop.eup %3426 }
 0xb1f   :  { %v3429_v62 = vpop.eup %3428  ;;  %1367 = vrot.lane.b32.xlu1 %v3427_v61, %s3528_s20 }
 0xb20   :  { %1365 = vrot.lane.b32.xlu0 %v3429_v62, %s3528_s20 }
 0xb91   :  { %v1368_v63 = vpop.permute.xlu1 %1367 }
 0xb92   :  { %v1372_v1 = vmul.f32 %v3423_v58, %v1368_v63  ;;  %v1366_v4 = vpop.permute.xlu0 %1365 }
 0xb93   :  { %v1371_v5 = vmul.f32 %v3425_v35, %v1366_v4 }
 0xb94   :  { %1377 = vrot.lane.b32.xlu1 %v1372_v1, %s3529_s21 }
 0xb95   :  { %1375 = vrot.lane.b32.xlu0 %v1371_v5, %s3529_s21 }
 0xc06   :  { %v1378_v7 = vpop.permute.xlu1 %1377 }
 0xc07   :  { %v1376_v6 = vpop.permute.xlu0 %1375 }
 0xc08   :  { %3079 = vmatprep.mubr.msk.f32.mxu0 %vm411_vm1, %v1376_v6 }
 0xc09   :  { %3080 = vmatmul.mubr.msk.f32.vlgmr.msra.gmra.mrb[22].mxu0 %vm411_vm1, %v1378_v7 }
 0xc0a   :  { %3284 = vmatpush3.bf16.msra.mxu0 %v3788_v47 }
 0xc0b   :  { %3286 = vmatprep.subr.bf16.mxu0 %v3804_v36 }
 0xc0e   :  { %3288 = vmatpush3.bf16.msra.mxu0 %v3804_v36 }
 0xc0f   :  { %3290 = vmatprep.subr.bf16.mxu0 %v3788_v47 }
 0xcdc   :  { %v3081_v3 = vpop.f32.mrb[22].mxu0 }
 0xcdd   :  { %v3349_v8 = vadd.f32 %v3081_v3, %v3845_v31  ;;  %v1449_v9 = vpop.f32.mrb[23].mxu0 }
 0xcde   :  { %v3350_v10 = vadd.f32 %v1449_v9, %v3845_v31 }
 0xcdf   :  { %3430 = vtanh.f32 %v3349_v8  ;;  %v2610_v13 = vmul.f32 -1.442695, %v3349_v8 }
 0xce0   :  { %3432 = vtanh.f32 %v3350_v10  ;;  %v2609_v14 = vmul.f32 -1.442695, %v3350_v10 }
 0xce1   :  { %3434 = vpow2.f32 %v2610_v13 }
 0xce2   :  { %3436 = vpow2.f32 %v2609_v14 }
 0xce9   :  { %v3431_v11 = vpop.eup %3430 }
 0xcea   :  { %v3433_v12 = vpop.eup %3432  ;;  %1480 = vrot.lane.b32.xlu1 %v3431_v11, %s3528_s20 }
 0xceb   :  { %1478 = vrot.lane.b32.xlu0 %v3433_v12, %s3528_s20  ;;  %v3435_v15 = vpop.eup %3434 }
 0xcec   :  { %v3437_v16 = vpop.eup %3436  ;;  %v1467_v17 = vadd.f32 1.0, %v3435_v15 }
 0xced   :  { %v1466_v18 = vadd.f32 1.0, %v3437_v16 }
 0xcee   :  { %3438 = vrcp.f32 %v1467_v17 }
 0xcef   :  { %3440 = vrcp.f32 %v1466_v18 }
 0xcf8   :  { %v3439_v19 = vpop.eup %3438 }
 0xcf9   :  { %v3441_v21 = vpop.eup %3440  ;;  %v1475_v25 = vmul.f32 %v3439_v19, %v1360_v43 }
 0xcfa   :  { %v1474_v27 = vmul.f32 %v3441_v21, %v1359_v60 }
 0xd5c   :  { %v1481_v20 = vpop.permute.xlu1 %1480 }
 0xd5d   :  { %v1485_v22 = vmul.f32 %v3439_v19, %v1481_v20  ;;  %v1479_v23 = vpop.permute.xlu0 %1478 }
 0xd5e   :  { %v1484_v24 = vmul.f32 %v3441_v21, %v1479_v23 }
 0xd5f   :  { %1490 = vrot.lane.b32.xlu1 %v1485_v22, %s3529_s21 }
 0xd60   :  { %1488 = vrot.lane.b32.xlu0 %v1484_v24, %s3529_s21 }
 0xdd1   :  { %v1491_v26 = vpop.permute.xlu1 %1490 }
 0xdd2   :  { %v1495_v28 = vadd.f32 %v1491_v26, %v1475_v25  ;;  %v1489_v29 = vpop.permute.xlu0 %1488 }
 0xdd3   :  { %v1494_v30 = vadd.f32 %v1489_v29, %v1474_v27 }
 0xdd4   :  { %3442 = vtanh.f32 %v1495_v28 }
 0xdd5   :  { %3444 = vtanh.f32 %v1494_v30 }
 0xdde   :  { %v3443_v32 = vpop.eup %3442 }
 0xddf   :  { %v3445_v33 = vpop.eup %3444  ;;  %1502 = vrot.lane.b32.xlu1 %v3443_v32, %s3528_s20 }
 0xde0   :  { %1500 = vrot.lane.b32.xlu0 %v3445_v33, %s3528_s20 }
 0xe51   :  { %v1503_v34 = vpop.permute.xlu1 %1502 }
 0xe52   :  { %v1507_v45 = vmul.f32 %v3439_v19, %v1503_v34  ;;  %v1501_v46 = vpop.permute.xlu0 %1500 }
 0xe53   :  { %v1506_v48 = vmul.f32 %v3441_v21, %v1501_v46 }
 0xe54   :  { %1512 = vrot.lane.b32.xlu1 %v1507_v45, %s3529_s21 }
 0xe55   :  { %1510 = vrot.lane.b32.xlu0 %v1506_v48, %s3529_s21 }
 0xec6   :  { %v1513_v50 = vpop.permute.xlu1 %1512 }
 0xec7   :  { %v1511_v49 = vpop.permute.xlu0 %1510 }
 0xec8   :  { %3090 = vmatprep.mubr.msk.f32.mxu0 %vm411_vm1, %v1511_v49 }
 0xec9   :  { %3091 = vmatmul.mubr.msk.f32.vlgmr.msra.gmra.mrb[24].mxu0 %vm411_vm1, %v1513_v50 }
 0xeca   :  { %3292 = vmatpush3.bf16.msra.mxu0 %v3788_v47 }
 0xecb   :  { %3294 = vmatprep.subr.bf16.mxu0 %v3804_v36 }
 0xece   :  { %3296 = vmatpush3.bf16.msra.mxu0 %v3804_v36 }
 0xecf   :  { %3298 = vmatprep.subr.bf16.mxu0 %v3788_v47 }
 0xf9c   :  { %v3092_v2 = vpop.f32.mrb[24].mxu0 }
 0xf9d   :  { %v3351_v51 = vadd.f32 %v3092_v2, %v3845_v31  ;;  %v1584_v52 = vpop.f32.mrb[25].mxu0 }
 0xf9e   :  { %v3352_v53 = vadd.f32 %v1584_v52, %v3845_v31 }
 0xf9f   :  { %3446 = vtanh.f32 %v3351_v51  ;;  %v2614_v56 = vmul.f32 -1.442695, %v3351_v51 }
 0xfa0   :  { %3448 = vtanh.f32 %v3352_v53  ;;  %v2613_v57 = vmul.f32 -1.442695, %v3352_v53 }
 0xfa1   :  { %3450 = vpow2.f32 %v2614_v56 }
 0xfa2   :  { %3452 = vpow2.f32 %v2613_v57 }
 0xfa9   :  { %v3447_v54 = vpop.eup %3446 }
 0xfaa   :  { %v3449_v55 = vpop.eup %3448  ;;  %1615 = vrot.lane.b32.xlu1 %v3447_v54, %s3528_s20 }
 0xfab   :  { %1613 = vrot.lane.b32.xlu0 %v3449_v55, %s3528_s20  ;;  %v3451_v58 = vpop.eup %3450 }
 0xfac   :  { %v3453_v59 = vpop.eup %3452  ;;  %v1602_v35 = vadd.f32 1.0, %v3451_v58 }
 0xfad   :  { %v1601_v37 = vadd.f32 1.0, %v3453_v59 }
 0xfae   :  { %3454 = vrcp.f32 %v1602_v35 }
 0xfaf   :  { %3456 = vrcp.f32 %v1601_v37 }
 0xfb8   :  { %v3455_v38 = vpop.eup %3454 }
 0xfb9   :  { %v3457_v40 = vpop.eup %3456  ;;  %v1610_v44 = vmul.f32 %v3455_v38, %v1495_v28 }
 0xfba   :  { %v1609_v61 = vmul.f32 %v3457_v40, %v1494_v30 }
0x101c   :  { %v1616_v39 = vpop.permute.xlu1 %1615 }
0x101d   :  { %v1620_v41 = vmul.f32 %v3455_v38, %v1616_v39  ;;  %v1614_v42 = vpop.permute.xlu0 %1613 }
0x101e   :  { %v1619_v43 = vmul.f32 %v3457_v40, %v1614_v42 }
0x101f   :  { %1625 = vrot.lane.b32.xlu1 %v1620_v41, %s3529_s21 }
0x1020   :  { %1623 = vrot.lane.b32.xlu0 %v1619_v43, %s3529_s21 }
0x1091   :  { %v1626_v60 = vpop.permute.xlu1 %1625 }
0x1092   :  { %v1630_v62 = vadd.f32 %v1626_v60, %v1610_v44  ;;  %v1624_v63 = vpop.permute.xlu0 %1623 }
0x1093   :  { %v1629_v1 = vadd.f32 %v1624_v63, %v1609_v61 }
0x1094   :  { %3458 = vtanh.f32 %v1630_v62 }
0x1095   :  { %3460 = vtanh.f32 %v1629_v1 }
0x109e   :  { %v3459_v4 = vpop.eup %3458 }
0x109f   :  { %v3461_v5 = vpop.eup %3460  ;;  %1637 = vrot.lane.b32.xlu1 %v3459_v4, %s3528_s20 }
0x10a0   :  { %1635 = vrot.lane.b32.xlu0 %v3461_v5, %s3528_s20 }
0x1111   :  { %v1638_v6 = vpop.permute.xlu1 %1637 }
0x1112   :  { %v1642_v7 = vmul.f32 %v3455_v38, %v1638_v6  ;;  %v1636_v3 = vpop.permute.xlu0 %1635 }
0x1113   :  { %v1641_v8 = vmul.f32 %v3457_v40, %v1636_v3 }
0x1114   :  { %1647 = vrot.lane.b32.xlu1 %v1642_v7, %s3529_s21 }
0x1115   :  { %1645 = vrot.lane.b32.xlu0 %v1641_v8, %s3529_s21 }
0x1186   :  { %v1648_v10 = vpop.permute.xlu1 %1647 }
0x1187   :  { %v1646_v9 = vpop.permute.xlu0 %1645 }
0x1188   :  { %3101 = vmatprep.mubr.msk.f32.mxu0 %vm411_vm1, %v1646_v9 }
0x1189   :  { %3102 = vmatmul.mubr.msk.f32.vlgmr.msra.gmra.mrb[26].mxu0 %vm411_vm1, %v1648_v10 }
0x118a   :  { %3300 = vmatpush3.bf16.msra.mxu0 %v3788_v47 }
0x118b   :  { %3302 = vmatprep.subr.bf16.mxu0 %v3804_v36 }
0x118e   :  { %3304 = vmatpush3.bf16.msra.mxu0 %v3804_v36 }
0x118f   :  { %3306 = vmatprep.subr.bf16.mxu0 %v3788_v47 }
0x125c   :  { %v3103_v11 = vpop.f32.mrb[26].mxu0 }
0x125d   :  { %v3353_v12 = vadd.f32 %v3103_v11, %v3845_v31  ;;  %v1719_v13 = vpop.f32.mrb[27].mxu0 }
0x125e   :  { %v3354_v14 = vadd.f32 %v1719_v13, %v3845_v31 }
0x125f   :  { %3462 = vtanh.f32 %v3353_v12  ;;  %v2618_v17 = vmul.f32 -1.442695, %v3353_v12 }
0x1260   :  { %3464 = vtanh.f32 %v3354_v14  ;;  %v2617_v18 = vmul.f32 -1.442695, %v3354_v14 }
0x1261   :  { %3466 = vpow2.f32 %v2618_v17 }
0x1262   :  { %3468 = vpow2.f32 %v2617_v18 }
0x1269   :  { %v3463_v15 = vpop.eup %3462 }
0x126a   :  { %v3465_v16 = vpop.eup %3464  ;;  %1750 = vrot.lane.b32.xlu1 %v3463_v15, %s3528_s20 }
0x126b   :  { %1748 = vrot.lane.b32.xlu0 %v3465_v16, %s3528_s20  ;;  %v3467_v19 = vpop.eup %3466 }
0x126c   :  { %v3469_v20 = vpop.eup %3468  ;;  %v1737_v21 = vadd.f32 1.0, %v3467_v19 }
0x126d   :  { %v1736_v22 = vadd.f32 1.0, %v3469_v20 }
0x126e   :  { %3470 = vrcp.f32 %v1737_v21 }
0x126f   :  { %3472 = vrcp.f32 %v1736_v22 }
0x1278   :  { %v3471_v23 = vpop.eup %3470 }
0x1279   :  { %v3473_v25 = vpop.eup %3472  ;;  %v1745_v29 = vmul.f32 %v3471_v23, %v1630_v62 }
0x127a   :  { %v1744_v32 = vmul.f32 %v3473_v25, %v1629_v1 }
0x12dc   :  { %v1751_v24 = vpop.permute.xlu1 %1750 }
0x12dd   :  { %v1755_v26 = vmul.f32 %v3471_v23, %v1751_v24  ;;  %v1749_v27 = vpop.permute.xlu0 %1748 }
0x12de   :  { %v1754_v28 = vmul.f32 %v3473_v25, %v1749_v27 }
0x12df   :  { %1760 = vrot.lane.b32.xlu1 %v1755_v26, %s3529_s21 }
0x12e0   :  { %1758 = vrot.lane.b32.xlu0 %v1754_v28, %s3529_s21 }
0x1351   :  { %v1761_v30 = vpop.permute.xlu1 %1760 }
0x1352   :  { %v1765_v33 = vadd.f32 %v1761_v30, %v1745_v29  ;;  %v1759_v34 = vpop.permute.xlu0 %1758 }
0x1353   :  { %v1764_v45 = vadd.f32 %v1759_v34, %v1744_v32 }
0x1354   :  { %3474 = vtanh.f32 %v1765_v33 }
0x1355   :  { %3476 = vtanh.f32 %v1764_v45 }
0x135e   :  { %v3475_v46 = vpop.eup %3474 }
0x135f   :  { %v3477_v48 = vpop.eup %3476  ;;  %1772 = vrot.lane.b32.xlu1 %v3475_v46, %s3528_s20 }
0x1360   :  { %1770 = vrot.lane.b32.xlu0 %v3477_v48, %s3528_s20  ;;  %v2048_v48 = vld [vmem:[%s4039_s2 + $0x68] sm:$0xff] }
0x13d1   :  { %v1773_v49 = vpop.permute.xlu1 %1772 }
0x13d2   :  { %v1777_v50 = vmul.f32 %v3471_v23, %v1773_v49  ;;  %v1771_v2 = vpop.permute.xlu0 %1770  ;;  %v2049_v49 = vld [vmem:[%s4039_s2 + $0x70] sm:$0xff] }
0x13d3   :  { %v1776_v51 = vmul.f32 %v3473_v25, %v1771_v2  ;;  %v3313_v2 = vpack.c.bf16 %v2049_v49, %v2048_v48 }
0x13d4   :  { %1782 = vrot.lane.b32.xlu1 %v1777_v50, %s3529_s21  ;;  %v2050_v50 = vld [vmem:[%s4039_s2 + $0x78] sm:$0xff] }
0x13d5   :  { %1780 = vrot.lane.b32.xlu0 %v1776_v51, %s3529_s21  ;;  %v2051_v51 = vld [vmem:[%s4039_s2 + $0x80] sm:$0xff]  ;;  %3314 = vmatprep.subr.bf16.mxu1 %v3313_v2 }
0x13d6   :  { %3316 = vmatpush3.bf16.msra.mxu1 %v3313_v2 }
0x1446   :  { %v1783_v53 = vpop.permute.xlu1 %1782 }
0x1447   :  { %v1781_v52 = vpop.permute.xlu0 %1780 }
0x1448   :  { %3112 = vmatprep.mubr.msk.f32.mxu0 %vm411_vm1, %v1781_v52  ;;  %v3317_v52 = vpack.c.bf16 %v2051_v51, %v2050_v50 }
0x1449   :  { %3113 = vmatmul.mubr.msk.f32.vlgmr.msra.gmra.mrb[28].mxu0 %vm411_vm1, %v1783_v53 }
0x144a   :  { %3308 = vmatpush3.bf16.msra.mxu0 %v3788_v47  ;;  %3318 = vmatprep.subr.bf16.mxu1 %v3317_v52 }
0x144b   :  { %3310 = vmatprep.subr.bf16.mxu0 %v3804_v36  ;;  %3320 = vmatpush3.bf16.msra.mxu1 %v3317_v52 }
0x144e   :  { %3312 = vmatpush3.bf16.msra.mxu0 %v3804_v36 }
0x151c   :  { %v3114_v54 = vpop.f32.mrb[28].mxu0 }
0x151d   :  { %v3355_v55 = vadd.f32 %v3114_v54, %v3845_v31  ;;  %v1854_v56 = vpop.f32.mrb[29].mxu0 }
0x151e   :  { %v3356_v57 = vadd.f32 %v1854_v56, %v3845_v31 }
0x151f   :  { %3478 = vtanh.f32 %v3355_v55  ;;  %v2622_v35 = vmul.f32 -1.442695, %v3355_v55 }
0x1520   :  { %3480 = vtanh.f32 %v3356_v57  ;;  %v2621_v47 = vmul.f32 -1.442695, %v3356_v57 }
0x1521   :  { %3482 = vpow2.f32 %v2622_v35 }
0x1522   :  { %3484 = vpow2.f32 %v2621_v47  ;;  %v2141_v47 = vld [vmem:[%s4039_s2 + $0x88] sm:$0xff] }
0x1529   :  { %v3479_v58 = vpop.eup %3478 }
0x152a   :  { %v3481_v59 = vpop.eup %3480  ;;  %1885 = vrot.lane.b32.xlu1 %v3479_v58, %s3528_s20 }
0x152b   :  { %1883 = vrot.lane.b32.xlu0 %v3481_v59, %s3528_s20  ;;  %v3483_v37 = vpop.eup %3482 }
0x152c   :  { %v3485_v36 = vpop.eup %3484  ;;  %v1872_v38 = vadd.f32 1.0, %v3483_v37  ;;  %v2142_v37 = vld [vmem:[%s4039_s2 + $0x90] sm:$0xff] }
0x152d   :  { %v1871_v39 = vadd.f32 1.0, %v3485_v36  ;;  %v3321_v36 = vpack.c.bf16 %v2142_v37, %v2141_v47 }
0x152e   :  { %3486 = vrcp.f32 %v1872_v38  ;;  %v2231_v38 = vld [vmem:[%s4039_s2 + $0x98] sm:$0xff] }
0x152f   :  { %3488 = vrcp.f32 %v1871_v39  ;;  %3322 = vmatprep.subr.bf16.mxu1 %v3321_v36  ;;  %v2232_v39 = vld [vmem:[%s4039_s2 + $0xa0] sm:$0xff] }
0x1538   :  { %v3487_v40 = vpop.eup %3486 }
0x1539   :  { %v3489_v42 = vpop.eup %3488  ;;  %v1880_v61 = vmul.f32 %v3487_v40, %v1765_v33 }
0x153a   :  { %v1879_v63 = vmul.f32 %v3489_v42, %v1764_v45 }
0x159c   :  { %v1886_v41 = vpop.permute.xlu1 %1885 }
0x159d   :  { %v1890_v43 = vmul.f32 %v3487_v40, %v1886_v41  ;;  %v1884_v44 = vpop.permute.xlu0 %1883  ;;  %v2054_v41 = vsub.s32 3, %v3730_v0 }
0x159e   :  { %v1889_v60 = vmul.f32 %v3489_v42, %v1884_v44 }
0x159f   :  { %1895 = vrot.lane.b32.xlu1 %v1890_v43, %s3529_s21 }
0x15a0   :  { %1893 = vrot.lane.b32.xlu0 %v1889_v60, %s3529_s21 }
0x1611   :  { %v1896_v62 = vpop.permute.xlu1 %1895 }
0x1612   :  { %v1900_v1 = vadd.f32 %v1896_v62, %v1880_v61  ;;  %v1894_v4 = vpop.permute.xlu0 %1893 }
0x1613   :  { %v1899_v5 = vadd.f32 %v1894_v4, %v1879_v63  ;;  %v2233_v63 = vld [vmem:[%s4039_s2 + $0xa8] sm:$0xff] }
0x1614   :  { %3490 = vtanh.f32 %v1900_v1 }
0x1615   :  { %3492 = vtanh.f32 %v1899_v5 }
0x161e   :  { %v3491_v6 = vpop.eup %3490 }
0x161f   :  { %v3493_v7 = vpop.eup %3492  ;;  %1907 = vrot.lane.b32.xlu1 %v3491_v6, %s3528_s20  ;;  %v2321_v6 = vld [vmem:[%s4039_s2 + $0xc0] sm:$0xff] }
0x1620   :  { %1905 = vrot.lane.b32.xlu0 %v3493_v7, %s3528_s20 }
0x1691   :  { %v1908_v3 = vpop.permute.xlu1 %1907 }
0x1692   :  { %v1912_v8 = vmul.f32 %v3487_v40, %v1908_v3  ;;  %v1906_v9 = vpop.permute.xlu0 %1905  ;;  %v3325_v40 = vpack.c.bf16 %v2232_v39, %v2231_v38  ;;  %v2145_v3 = vsub.s32 4, %v3730_v0 }
0x1693   :  { %v1911_v10 = vmul.f32 %v3489_v42, %v1906_v9  ;;  %v3526_v42 = vld [vmem:[%s4039_s2 + $0xc8] sm:$0xff] }
0x1694   :  { %1917 = vrot.lane.b32.xlu1 %v1912_v8, %s3529_s21  ;;  %v2055_v43 = vrot.slane %v3526_v42, %v2054_v41  ;;  %v2146_v8 = vrot.slane %v3526_v42, %v2145_v3 }
0x1695   :  { %1915 = vrot.lane.b32.xlu0 %v1911_v10, %s3529_s21 }
0x1706   :  { %v1918_v12 = vpop.permute.xlu1 %1917 }
0x1707   :  { %v1916_v11 = vpop.permute.xlu0 %1915 }
0x1708   :  { %3123 = vmatprep.mubr.msk.f32.mxu0 %vm411_vm1, %v1916_v11 }
0x1709   :  { %3124 = vmatmul.mubr.msk.f32.vlgmr.msra.gmra.mrb[30].mxu0 %vm411_vm1, %v1918_v12 }
0x17dc   :  { %v3125_v13 = vpop.f32.mrb[30].mxu0 }
0x17dd   :  { %v3357_v14 = vadd.f32 %v3125_v13, %v3845_v31  ;;  %v1989_v15 = vpop.f32.mrb[31].mxu0 }
0x17de   :  { %v3358_v16 = vadd.f32 %v1989_v15, %v3845_v31 }
0x17df   :  { %3494 = vtanh.f32 %v3357_v14  ;;  %v2626_v19 = vmul.f32 -1.442695, %v3357_v14 }
0x17e0   :  { %3496 = vtanh.f32 %v3358_v16  ;;  %v2625_v20 = vmul.f32 -1.442695, %v3358_v16 }
0x17e1   :  { %3498 = vpow2.f32 %v2626_v19 }
0x17e2   :  { %3500 = vpow2.f32 %v2625_v20 }
0x17e9   :  { %v3495_v17 = vpop.eup %3494 }
0x17ea   :  { %v3497_v18 = vpop.eup %3496  ;;  %2020 = vrot.lane.b32.xlu1 %v3495_v17, %s3528_s20 }
0x17eb   :  { %2018 = vrot.lane.b32.xlu0 %v3497_v18, %s3528_s20  ;;  %v3499_v21 = vpop.eup %3498  ;;  %v2237_v18 = vsub.s32 5, %v3730_v0 }
0x17ec   :  { %v3501_v22 = vpop.eup %3500  ;;  %v2007_v23 = vadd.f32 1.0, %v3499_v21 }
0x17ed   :  { %v2006_v24 = vadd.f32 1.0, %v3501_v22  ;;  %v2238_v19 = vrot.slane %v3526_v42, %v2237_v18 }
0x17ee   :  { %3502 = vrcp.f32 %v2007_v23 }
0x17ef   :  { %3504 = vrcp.f32 %v2006_v24  ;;  %v2324_v24 = vsub.s32 6, %v3730_v0 }
0x17f8   :  { %v3503_v25 = vpop.eup %3502 }
0x17f9   :  { %v3505_v26 = vpop.eup %3504  ;;  %v2015_v30 = vmul.f32 %v3503_v25, %v1900_v1  ;;  %v2234_v1 = vld [vmem:[%s4039_s2 + $0xb0] sm:$0xff] }
0x17fa   :  { %v2014_v33 = vmul.f32 %v3505_v26, %v1899_v5  ;;  %v3329_v4 = vpack.c.bf16 %v2234_v1, %v2233_v63  ;;  %v2320_v5 = vld [vmem:[%s4039_s2 + $0xb8] sm:$0xff]  ;;  %s3531_s2 = smov 16  }
0x17fb   :  { %v3333_v7 = vpack.c.bf16 %v2321_v6, %v2320_v5 }
0x185c   :  { %v2021_v31 = vpop.permute.xlu1 %2020 }
0x185d   :  { %v2025_v27 = vmul.f32 %v3503_v25, %v2021_v31  ;;  %v2019_v28 = vpop.permute.xlu0 %2018 }
0x185e   :  { %v2024_v29 = vmul.f32 %v3505_v26, %v2019_v28 }
0x185f   :  { %2030 = vrot.lane.b32.xlu1 %v2025_v27, %s3529_s21 }
0x1860   :  { %2028 = vrot.lane.b32.xlu0 %v2024_v29, %s3529_s21 }
0x18d1   :  { %v2031_v32 = vpop.permute.xlu1 %2030 }
0x18d2   :  { %v2035_v34 = vadd.f32 %v2031_v32, %v2015_v30  ;;  %v2029_v45 = vpop.permute.xlu0 %2028 }
0x18d3   :  { %v2034_v46 = vadd.f32 %v2029_v45, %v2014_v33 }
0x18d4   :  { %3506 = vtanh.f32 %v2035_v34 }
0x18d5   :  { %3508 = vtanh.f32 %v2034_v46 }
0x18de   :  { %v3507_v53 = vpop.eup %3506 }
0x18df   :  { %v3509_v54 = vpop.eup %3508  ;;  %2042 = vrot.lane.b32.xlu1 %v3507_v53, %s3528_s20 }
0x18e0   :  { %2040 = vrot.lane.b32.xlu0 %v3509_v54, %s3528_s20  ;;  %s3532_s20 = smov 24  }
0x1951   :  { %v2043_v55 = vpop.permute.xlu1 %2042 }
0x1952   :  { %v2047_v56 = vmul.f32 %v3503_v25, %v2043_v55  ;;  %v2041_v57 = vpop.permute.xlu0 %2040  ;;  %v2325_v25 = vrot.slane %v3526_v42, %v2324_v24 }
0x1953   :  { %v2046_v58 = vmul.f32 %v3505_v26, %v2041_v57 }
0x1954   :  { %2060 = vrot.lane.b32.xlu1 %v2047_v56, %s3529_s21 }
0x1955   :  { %2058 = vrot.lane.b32.xlu0 %v2046_v58, %s3529_s21  ;;  %s3533_s21 = smov 40  }
0x19c6   :  { %v2061_v35 = vpop.permute.xlu1 %2060 }
0x19c7   :  { %v2059_v59 = vpop.permute.xlu0 %2058 }
0x19c8   :  { %3134 = vmatprep.mubr.msk.f32.mxu1 %vm411_vm1, %v2059_v59 }
0x19c9   :  { %3135 = vmatmul.mubr.msk.f32.vlgmr.msra.gmra.mrb[48].mxu1 %vm411_vm1, %v2061_v35 }
0x19ca   :  { %3324 = vmatpush3.bf16.msra.mxu1 %v3321_v36 }
0x19cb   :  { %3326 = vmatprep.subr.bf16.mxu1 %v3325_v40 }
0x1a9c   :  { %v3136_v44 = vpop.f32.mrb[48].mxu1 }
0x1a9d   :  { %v2132_v60 = vpop.f32.mrb[49].mxu1  ;;  %v3996_v62 = vadd.f32 %v3136_v44, %v2055_v43 }
0x1a9e   :  { %v3994_v61 = vadd.f32 %v2132_v60, %v2055_v43 }
0x1aa0   :  { %3141 = vmatprep.mubr.msk.f32.mxu1 %vm2147_vm2, %v3994_v61  ;;  %v3337_v15 = vpack.c.bf16 %v3996_v62, %v3994_v61 }
0x1aa1   :  { %3142 = vmatmul.mubr.msk.f32.vlgmr.msra.gmra.mrb[50].mxu1 %vm2147_vm2, %v3996_v62 }
0x1aa2   :  { %3328 = vmatpush3.bf16.msra.mxu1 %v3325_v40 }
0x1aa3   :  { %3330 = vmatprep.subr.bf16.mxu1 %v3329_v4 }
0x1aa6   :  { %3332 = vmatpush3.bf16.msra.mxu1 %v3329_v4 }
0x1aa7   :  { %3334 = vmatprep.subr.bf16.mxu1 %v3333_v7 }
0x1b74   :  { %v3143_v9 = vpop.f32.mrb[50].mxu1 }
0x1b75   :  { %v2226_v10 = vadd.f32 %v3143_v9, %v2146_v8  ;;  %v2220_v11 = vpop.f32.mrb[51].mxu1 }
0x1b76   :  { %v2221_v12 = vadd.f32 %v2220_v11, %v2146_v8 }
0x1b77   :  { %v2230_v13 = vmax.f32 %v2226_v10, 0.0 }
0x1b78   :  { %v2229_v14 = vmax.f32 %v2221_v12, 0.0 }
0x1b79   :  { %2328 = vrot.lane.b32.xlu1 %v2230_v13, %s3530_s19 }
0x1b7a   :  { %2326 = vrot.lane.b32.xlu0 %v2229_v14, %s3530_s19  ;;  %3152 = vmatprep.mubr.msk.f32.mxu1 %vm411_vm1, %v2229_v14 }
0x1b7b   :  { %3153 = vmatmul.mubr.msk.f32.vlgmr.msra.gmra.mrb[52].mxu1 %vm411_vm1, %v2230_v13 }
0x1b7c   :  { %3336 = vmatpush3.bf16.msra.mxu1 %v3333_v7 }
0x1b7d   :  { %3339 = vmatprep.subr.msk.bf16.mxu1 %vm3338_vm3, %v3337_v15 }
0x1beb   :  { %v2329_v17 = vpop.permute.xlu1 %2328 }
0x1bec   :  { %v2327_v16 = vpop.permute.xlu0 %2326 }
0x1bed   :  { %3159 = vmatprep.mubr.msk.f32.mxu1 %vm2147_vm2, %v2327_v16 }
0x1bee   :  { %3160 = vmatmul.mubr.msk.f32.vlgmr.msra.gmra.mrb[54].mxu1 %vm2147_vm2, %v2329_v17 }
0x1bef   :  { %3342 = vmatpush3.bf16.xpose.msk.msra.mxu1 %vm3338_vm3, %v3337_v15  ;;  %3166 = vmatprep.mubr.msk.f32.mxu1 %vm2147_vm2, %v3994_v61 }
0x1bf6   :  { %3167 = vmatmul.mubr.msk.f32.vlgmr.msra.gmra.mrb[56].mxu1 %vm2147_vm2, %v3996_v62 }
0x1c4e   :  { %v3154_v20 = vpop.f32.mrb[52].mxu1 }
0x1c4f   :  { %v2317_v21 = vadd.f32 %v3154_v20, %v2238_v19  ;;  %v2311_v22 = vpop.f32.mrb[53].mxu1 }
0x1c50   :  { %v2312_v23 = vadd.f32 %v2311_v22, %v2238_v19 }
0x1c51   :  { %2512 = vrot.lane.b32.xlu1 %v2317_v21, %s3531_s2 }
0x1c52   :  { %2510 = vrot.lane.b32.xlu0 %v2312_v23, %s3531_s2 }
0x1cc1   :  { %v3161_v31 = vpop.f32.mrb[54].mxu1 }
0x1cc2   :  { %v2406_v26 = vadd.f32 %v3161_v31, %v2325_v25  ;;  %v2400_v27 = vpop.f32.mrb[55].mxu1 }
0x1cc3   :  { %v2401_v28 = vadd.f32 %v2400_v27, %v2325_v25  ;;  %v2513_v57 = vpop.permute.xlu1 %2512 }
0x1cc4   :  { %v2636_v29 = vmul.f32 -1.442695, %v2406_v26  ;;  %v2511_v58 = vpop.permute.xlu0 %2510  ;;  %v2533_v47 = vsel %vm2147_vm2, %v3996_v62, %v2513_v57 }
0x1cc5   :  { %v2635_v30 = vmul.f32 -1.442695, %v2401_v28  ;;  %v2532_v37 = vsel %vm2147_vm2, %v3994_v61, %v2511_v58 }
0x1cc6   :  { %3510 = vpow2.f32 %v2636_v29 }
0x1cc7   :  { %3512 = vpow2.f32 %v2635_v30 }
0x1cc9   :  { %v3168_v32 = vpop.f32.mrb[56].mxu1 }
0x1cca   :  { %v2642_v33 = vmul.f32 -1.442695, %v3168_v32  ;;  %v2487_v34 = vpop.f32.mrb[57].mxu1 }
0x1ccb   :  { %v2641_v45 = vmul.f32 -1.442695, %v2487_v34 }
0x1ccc   :  { %3514 = vpow2.f32 %v2642_v33 }
0x1ccd   :  { %3516 = vpow2.f32 %v2641_v45 }
0x1cd0   :  { %v3511_v46 = vpop.eup %3510 }
0x1cd1   :  { %v3513_v48 = vpop.eup %3512  ;;  %v2416_v51 = vadd.f32 1.0, %v3511_v46 }
0x1cd2   :  { %v2415_v52 = vadd.f32 1.0, %v3513_v48 }
0x1cd6   :  { %v3515_v49 = vpop.eup %3514 }
0x1cd7   :  { %v3517_v50 = vpop.eup %3516  ;;  %v2503_v0 = vadd.f32 1.0, %v3515_v49 }
0x1cd8   :  { %v2502_v2 = vadd.f32 1.0, %v3517_v50 }
0x1cd9   :  { %3518 = vrcp.f32 %v2503_v0 }
0x1cda   :  { %3520 = vrcp.f32 %v2502_v2 }
0x1cdb   :  { %3522 = vrcp.f32 %v2416_v51 }
0x1cdc   :  { %3524 = vrcp.f32 %v2415_v52 }
0x1ce3   :  { %v3519_v53 = vpop.eup %3518 }
0x1ce4   :  { %v3521_v54 = vpop.eup %3520  ;;  %2520 = vrot.lane.b32.xlu1 %v3519_v53, %s3532_s20 }
0x1ce5   :  { %2518 = vrot.lane.b32.xlu0 %v3521_v54, %s3532_s20  ;;  %v3523_v55 = vpop.eup %3522 }
0x1ce6   :  { %v3525_v56 = vpop.eup %3524 }
0x1ce8   :  { %2528 = vrot.lane.b32.xlu1 %v3523_v55, %s3533_s21 }
0x1ce9   :  { %2526 = vrot.lane.b32.xlu0 %v3525_v56, %s3533_s21 }
0x1d56   :  { %v2521_v59 = vpop.permute.xlu1 %2520 }
0x1d57   :  { %v2519_v35 = vpop.permute.xlu0 %2518  ;;  %v2536_v36 = vsel %vm2534_vm4, %v2533_v47, %v2521_v59 }
0x1d58   :  { %v2535_v39 = vsel %vm2534_vm4, %v2532_v37, %v2519_v35 }
0x1d5a   :  { %v2529_v38 = vpop.permute.xlu1 %2528 }
0x1d5b   :  { %v2539_v40 = vsel %vm2537_vm5, %v2536_v36, %v2529_v38  ;;  %v2527_v41 = vpop.permute.xlu0 %2526 }
0x1d5c   :  { %v2542_v42 = vsel %vm2540_vm6, %v2539_v40, 0.0  ;;  %v2538_v43 = vsel %vm2537_vm5, %v2535_v39, %v2527_v41 }
0x1d5d   :  { %2544 = vst [vmem:[%s4042_s3 + $0x8] sm:$0xff] %v2542_v42  ;;  %v2541_v44 = vsel %vm2540_vm6, %v2538_v43, 0.0 }
0x1d5e   :  { %2543 = vst [vmem:[%s4042_s3] sm:$0xff] %v2541_v44 }

</bundles_post_ra>
